<compile_context>
chip_gen: v6e
topology: v6e:2x2x1
jax: 0.10.0
libtpu: 0.0.40
codegen_flags: <defaults>
</compile_context>

<pallas_src>
import functools

import jax
import jax.numpy as jnp
from jax.experimental import pallas as pl
from jax.experimental.pallas import tpu as pltpu

NEG_INF = -1e9  # large-negative instead of -inf (keeps fully-masked rows NaN-free)


# ----------------------------------------------------------------------------
# Fused kernel: one (batch element, query tile) per grid step
# ----------------------------------------------------------------------------
def fusion_kernel(tgt_ref, yq_ref, ykv_ref, yr_ref, spad_ref, cpad_ref,
                  w_q_ref, b_q_ref, w_kvs_ref, b_kvs_ref, w_kvc_ref, b_kvc_ref,
                  w_o_ref, b_o_ref, gamma_ref, beta_ref,
                  out_ref, *, num_heads, head_dim, eps):
    E = num_heads * head_dim

    yq = yq_ref[0]        # (TQ, E) f32  -- query tile (also the residual)
    ykv = ykv_ref[0]      # (S1, E) f32  -- full keys/values for self-attention
    yr = yr_ref[0]        # (S2, E) f32  -- full keys/values for cross-attention

    # --- projections (bf16 MXU inputs, f32 accumulation) -----------------------
    # 1/sqrt(head_dim) is folded into the q weights/biases in the wrapper.
    proj_q = jnp.dot(yq.astype(jnp.bfloat16), w_q_ref[...],
                     preferred_element_type=jnp.float32) + b_q_ref[...]    # (TQ, 2E)
    kv_s = jnp.dot(ykv.astype(jnp.bfloat16), w_kvs_ref[...],
                   preferred_element_type=jnp.float32) + b_kvs_ref[...]    # (S1, 2E)
    kv_c = jnp.dot(yr.astype(jnp.bfloat16), w_kvc_ref[...],
                   preferred_element_type=jnp.float32) + b_kvc_ref[...]    # (S2, 2E)

    q_bf = proj_q.astype(jnp.bfloat16)
    kvs_bf = kv_s.astype(jnp.bfloat16)
    kvc_bf = kv_c.astype(jnp.bfloat16)

    def split_heads(x2d, base):
        # (S, *) lane slices starting at `base`, stacked -> (H, S, Dh)
        # TODO(synk): replace with x.reshape(S,H,Dh) + pltpu.einshape("shd->hsd") once the
        # reshape/relayout is verified to lower cleanly at production Dh; the slice+stack
        # form is kept because it is proven to compile on this toolchain.
        return jnp.stack(
            [x2d[:, base + h * head_dim: base + (h + 1) * head_dim]
             for h in range(num_heads)], axis=0)

    q_self = split_heads(q_bf, 0)       # (H, TQ, Dh)
    q_cross = split_heads(q_bf, E)      # (H, TQ, Dh)
    k_self = split_heads(kvs_bf, 0)     # (H, S1, Dh)
    v_self = split_heads(kvs_bf, E)     # (H, S1, Dh)
    k_cross = split_heads(kvc_bf, 0)    # (H, S2, Dh)
    v_cross = split_heads(kvc_bf, E)    # (H, S2, Dh)

    # --- additive masks built in VMEM from compact inputs ----------------------
    self_bias = tgt_ref[...] + spad_ref[0]     # (TQ,S1) + (1,S1) -> (TQ,S1)
    cross_bias = cpad_ref[0]                   # (1,S2): broadcasts over query rows

    def attention(q3, k3, v3, bias):
        # q3: (H,TQ,Dh), k3/v3: (H,Sk,Dh) bf16; bias: (TQ,Sk) or (1,Sk) f32 additive
        s = jnp.einsum("hqd,hkd->hqk", q3, k3,
                       preferred_element_type=jnp.float32)        # (H, TQ, Sk) f32
        s = s + bias[None, :, :]
        s = s - jnp.max(s, axis=-1, keepdims=True)
        p = jnp.exp(s)
        p = p * pl.reciprocal(jnp.sum(p, axis=-1, keepdims=True), approx=True)
        return jnp.einsum("hqk,hkd->hqd", p.astype(jnp.bfloat16), v3,
                          preferred_element_type=jnp.float32)     # (H, TQ, Dh) f32

    # TODO(synk): for very long key sequences, stream keys flash-style (online softmax)
    # inside this kernel so the (H,TQ,Sk) score buffer is bounded by a key tile as well.
    o_s = attention(q_self, k_self, v_self, self_bias)
    o_c = attention(q_cross, k_cross, v_cross, cross_bias)

    # --- fused output projection: one 2E-deep matmul + residual ----------------
    o_cat = jnp.concatenate([o_s[h] for h in range(num_heads)]
                            + [o_c[h] for h in range(num_heads)], axis=-1)   # (TQ, 2E)
    attn_out = jnp.dot(o_cat.astype(jnp.bfloat16), w_o_ref[...],
                       preferred_element_type=jnp.float32) + b_o_ref[...]    # (TQ, E)

    x = attn_out + yq

    # --- LayerNorm (fp32) -------------------------------------------------------
    mu = jnp.mean(x, axis=-1, keepdims=True)
    var = jnp.mean((x - mu) ** 2, axis=-1, keepdims=True)
    xn = (x - mu) * jax.lax.rsqrt(var + eps)
    out_ref[0] = xn * gamma_ref[...] + beta_ref[...]


# ----------------------------------------------------------------------------
# Wrapper: weight fusion / scale folding / compact masks / pallas_call
# ----------------------------------------------------------------------------
def _pick_tq(s1):
    if s1 <= 256:
        return s1
    for t in (256, 128, 64, 32, 16, 8):
        if s1 % t == 0:
            return t
    # TODO(synk): ragged S1 (not a multiple of 8) above 256 falls back to no tiling.
    return s1


def _const_spec(shape):
    # Constant block every grid step -> request single buffering (halves weight VMEM).
    index_map = lambda b, qi, _n=len(shape): (0,) * _n
    try:
        return pl.BlockSpec(shape, index_map, pipeline_mode=pl.Buffered(1))
    except Exception:  # pipeline_mode / Buffered unavailable -> default double buffering
        return pl.BlockSpec(shape, index_map)


def _vmem_limit_bytes():
    try:
        cap = int(pltpu.get_tpu_info().vmem_capacity_bytes)
    except Exception:
        cap = 64 * 1024 * 1024
    # ~75% of physical, capped at 100 MiB (=> ~48 MiB on v7x, ~96 MiB on v5e/v6e).
    return min((cap * 3) // 4, 100 * 1024 * 1024)


def fusion_layer_pallas(y, y_r, y_mask, y_ref_mask, tgt_mask, params):
    B, S1, E = y.shape
    S2 = y_r.shape[1]
    H = params["num_heads"]
    Dh = E // H
    scale = 1.0 / (Dh ** 0.5)

    TQ = _pick_tq(S1)
    NQ = S1 // TQ if S1 % TQ == 0 else 1
    if S1 % TQ != 0:
        TQ = S1

    # Fused projection weights, stored bf16 (halves weight DMA / VMEM).
    w_q = jnp.concatenate([params["self_wq_t"] * scale,
                           params["cross_wq_t"] * scale], axis=1).astype(jnp.bfloat16)
    b_q = jnp.concatenate([params["self_bq"] * scale,
                           params["cross_bq"] * scale], axis=1).astype(jnp.float32)
    w_kvs = jnp.concatenate([params["self_wk_t"],
                             params["self_wv_t"]], axis=1).astype(jnp.bfloat16)
    b_kvs = jnp.concatenate([params["self_bk"],
                             params["self_bv"]], axis=1).astype(jnp.float32)
    w_kvc = jnp.concatenate([params["cross_wk_t"],
                             params["cross_wv_t"]], axis=1).astype(jnp.bfloat16)
    b_kvc = jnp.concatenate([params["cross_bk"],
                             params["cross_bv"]], axis=1).astype(jnp.float32)
    # Fused output projection: [o_self | o_cross] @ [[Wo_self],[Wo_cross]]
    w_o = jnp.concatenate([params["self_wo_t"],
                           params["cross_wo_t"]], axis=0).astype(jnp.bfloat16)   # (2E, E)
    b_o = (params["self_bo"] + params["cross_bo"]).astype(jnp.float32)
    gamma = params["ln_gamma"].astype(jnp.float32)
    beta = params["ln_beta"].astype(jnp.float32)

    # Compact additive key-padding biases: (B,1,S) instead of (B,S1,S) in HBM.
    pad_self = jnp.where(y_mask, NEG_INF, 0.0).astype(jnp.float32)[:, None, :]      # (B,1,S1)
    pad_cross = jnp.where(y_ref_mask, NEG_INF, 0.0).astype(jnp.float32)[:, None, :]  # (B,1,S2)
    tgt = tgt_mask.astype(jnp.float32)                                               # (S1,S1)

    const_params = [w_q, b_q, w_kvs, b_kvs, w_kvc, b_kvc, w_o, b_o, gamma, beta]

    in_specs = (
        [pl.BlockSpec((TQ, S1), lambda b, qi: (qi, 0)),          # tgt_mask query-tile rows
         pl.BlockSpec((1, TQ, E), lambda b, qi: (b, qi, 0)),     # y query tile (+residual)
         pl.BlockSpec((1, S1, E), lambda b, qi: (b, 0, 0)),      # y full (self K/V source)
         pl.BlockSpec((1, S2, E), lambda b, qi: (b, 0, 0)),      # y_r full (cross K/V source)
         pl.BlockSpec((1, 1, S1), lambda b, qi: (b, 0, 0)),      # self key-padding bias
         pl.BlockSpec((1, 1, S2), lambda b, qi: (b, 0, 0))]      # cross key-padding bias
        + [_const_spec(p.shape) for p in const_params])

    out_spec = pl.BlockSpec((1, TQ, E), lambda b, qi: (b, qi, 0))

    kernel = functools.partial(fusion_kernel, num_heads=H, head_dim=Dh, eps=1e-5)

    return pl.pallas_call(
        kernel,
        out_shape=jax.ShapeDtypeStruct((B, S1, E), jnp.float32),
        grid_spec=pltpu.PrefetchScalarGridSpec(
            num_scalar_prefetch=0,
            grid=(B, NQ),
            in_specs=in_specs,
            out_specs=out_spec,
        ),
        compiler_params=pltpu.CompilerParams(
            dimension_semantics=("parallel", "parallel"),
            vmem_limit_bytes=_vmem_limit_bytes(),
        ),
    )(tgt, y, y, y_r, pad_self, pad_cross, *const_params)


# ----------------------------------------------------------------------------
# Pure-JAX fp32 reference (same math as the PyTorch module) for validation
# ----------------------------------------------------------------------------
def _mha_ref(q_in, k_in, v_in, wq_t, bq, wk_t, bk, wv_t, bv, wo_t, bo,
             add_mask, num_heads, head_dim):
    B, Sq, E = q_in.shape
    Sk = k_in.shape[1]
    q = (q_in @ wq_t + bq).reshape(B, Sq, num_heads, head_dim).transpose(0, 2, 1, 3)
    k = (k_in @ wk_t + bk).reshape(B, Sk, num_heads, head_dim).transpose(0, 2, 1, 3)
    v = (v_in @ wv_t + bv).reshape(B, Sk, num_heads, head_dim).transpose(0, 2, 1, 3)
    s = jnp.einsum("bhqd,bhkd->bhqk", q, k) / (head_dim ** 0.5) + add_mask[:, None]
    p = jax.nn.softmax(s, axis=-1)
    o = jnp.einsum("bhqk,bhkd->bhqd", p, v).transpose(0, 2, 1, 3).reshape(B, Sq, E)
    return o @ wo_t + bo


def fusion_layer_ref(y, y_r, y_mask, y_ref_mask, tgt_mask, params):
    B, S1, E = y.shape
    S2 = y_r.shape[1]
    H = params["num_heads"]
    Dh = E // H
    self_add = tgt_mask[None] + jnp.where(y_mask[:, None, :], NEG_INF, 0.0)
    cross_add = jnp.broadcast_to(
        jnp.where(y_ref_mask[:, None, :], NEG_INF, 0.0), (B, S1, S2))
    so = _mha_ref(y, y, y, params["self_wq_t"], params["self_bq"],
                  params["self_wk_t"], params["self_bk"],
                  params["self_wv_t"], params["self_bv"],
                  params["self_wo_t"], params["self_bo"], self_add, H, Dh)
    co = _mha_ref(y, y_r, y_r, params["cross_wq_t"], params["cross_bq"],
                  params["cross_wk_t"], params["cross_bk"],
                  params["cross_wv_t"], params["cross_bv"],
                  params["cross_wo_t"], params["cross_bo"], cross_add, H, Dh)
    x = so + co + y
    mu = jnp.mean(x, axis=-1, keepdims=True)
    var = jnp.mean((x - mu) ** 2, axis=-1, keepdims=True)
    return (x - mu) * jax.lax.rsqrt(var + 1e-5) * params["ln_gamma"] + params["ln_beta"]


# ----------------------------------------------------------------------------
# Deterministic parameter init (synthetic — not a checkpoint load)
# ----------------------------------------------------------------------------
def init_params(key, embed_dim, num_heads):
    ks = jax.random.split(key, 20)
    u = lambda k, shape: jax.random.uniform(k, shape, jnp.float32, -0.1, 0.1)
    return {
        "num_heads": num_heads,
        # self-attn (weights pre-transposed: x @ W_t == x @ W.T in PyTorch terms)
        "self_wq_t": u(ks[0], (embed_dim, embed_dim)),
        "self_wk_t": u(ks[1], (embed_dim, embed_dim)),
        "self_wv_t": u(ks[2], (embed_dim, embed_dim)),
        "self_bq": u(ks[3], (1, embed_dim)),
        "self_bk": u(ks[4], (1, embed_dim)),
        "self_bv": u(ks[5], (1, embed_dim)),
        "self_wo_t": u(ks[6], (embed_dim, embed_dim)),
        "self_bo": u(ks[7], (1, embed_dim)),
        # cross-attn
        "cross_wq_t": u(ks[8], (embed_dim, embed_dim)),
        "cross_wk_t": u(ks[9], (embed_dim, embed_dim)),
        "cross_wv_t": u(ks[10], (embed_dim, embed_dim)),
        "cross_bq": u(ks[11], (1, embed_dim)),
        "cross_bk": u(ks[12], (1, embed_dim)),
        "cross_bv": u(ks[13], (1, embed_dim)),
        "cross_wo_t": u(ks[14], (embed_dim, embed_dim)),
        "cross_bo": u(ks[15], (1, embed_dim)),
        # LayerNorm
        "ln_gamma": jnp.ones((1, embed_dim), jnp.float32),
        "ln_beta": jnp.zeros((1, embed_dim), jnp.float32),
    }


if __name__ == "__main__":
    B, S1, S2, E, H = 2, 8, 8, 32, 4
    key = jax.random.PRNGKey(0)
    k_y, k_yr, k_p = jax.random.split(key, 3)

    y = jax.random.normal(k_y, (B, S1, E), jnp.float32)
    y_r = jax.random.normal(k_yr, (B, S2, E), jnp.float32)

    # key_padding masks: True = ignore that key position
    y_mask = jnp.zeros((B, S1), dtype=bool).at[1, -2:].set(True)
    y_ref_mask = jnp.zeros((B, S2), dtype=bool).at[0, -1:].set(True)
    # causal attn_mask for the self-attention (additive float mask)
    tgt_mask = jnp.where(jnp.triu(jnp.ones((S1, S1), dtype=bool), k=1),
                         NEG_INF, 0.0).astype(jnp.float32)

    params = init_params(k_p, E, H)

    out = fusion_layer_pallas(y, y_r, y_mask, y_ref_mask, tgt_mask, params)
    jax.block_until_ready(out)

    ref = fusion_layer_ref(y, y_r, y_mask, y_ref_mask, tgt_mask, params)
    assert out.shape == (B, S1, E)
    # bf16 MXU inputs + approx reciprocal => looser tolerance than pure-fp32
    assert jnp.allclose(out, ref, atol=2e-2, rtol=2e-2), "mismatch vs JAX reference"

    print("KERNEL_OK")
</pallas_src>

<mosaic_0001>
module attributes {stable_mosaic.version = 11 : i64} {
  func.func @fusion_kernel(%arg0: i32, %arg1: i32, %arg2: memref<8x8xf32, #tpu.memory_space<vmem>>, %arg3: memref<1x8x32xf32, #tpu.memory_space<vmem>>, %arg4: memref<1x8x32xf32, #tpu.memory_space<vmem>>, %arg5: memref<1x8x32xf32, #tpu.memory_space<vmem>>, %arg6: memref<1x1x8xf32, #tpu.memory_space<vmem>>, %arg7: memref<1x1x8xf32, #tpu.memory_space<vmem>>, %arg8: memref<32x64xbf16, #tpu.memory_space<vmem>>, %arg9: memref<1x64xf32, #tpu.memory_space<vmem>>, %arg10: memref<32x64xbf16, #tpu.memory_space<vmem>>, %arg11: memref<1x64xf32, #tpu.memory_space<vmem>>, %arg12: memref<32x64xbf16, #tpu.memory_space<vmem>>, %arg13: memref<1x64xf32, #tpu.memory_space<vmem>>, %arg14: memref<64x32xbf16, #tpu.memory_space<vmem>>, %arg15: memref<1x32xf32, #tpu.memory_space<vmem>>, %arg16: memref<1x32xf32, #tpu.memory_space<vmem>>, %arg17: memref<1x32xf32, #tpu.memory_space<vmem>>, %arg18: memref<1x8x32xf32, #tpu.memory_space<vmem>>) attributes {dimension_semantics = [#tpu.dimension_semantics<parallel>, #tpu.dimension_semantics<parallel>], iteration_bounds = array<i64: 2, 1>, scalar_prefetch = 0 : i64, scratch_operands = 0 : i64, tpu.core_type = #tpu.core_type<tc>, window_params = [{transform_indices = @transform_0, window_bounds = array<i64: 8, 8>}, {transform_indices = @transform_1, window_bounds = array<i64: 1, 8, 32>}, {transform_indices = @transform_2, window_bounds = array<i64: 1, 8, 32>}, {transform_indices = @transform_3, window_bounds = array<i64: 1, 8, 32>}, {transform_indices = @transform_4, window_bounds = array<i64: 1, 1, 8>}, {transform_indices = @transform_5, window_bounds = array<i64: 1, 1, 8>}, {pipeline_mode = #tpu.pipeline_mode<synchronous>, transform_indices = @transform_6, window_bounds = array<i64: 32, 64>}, {pipeline_mode = #tpu.pipeline_mode<synchronous>, transform_indices = @transform_7, window_bounds = array<i64: 1, 64>}, {pipeline_mode = #tpu.pipeline_mode<synchronous>, transform_indices = @transform_8, window_bounds = array<i64: 32, 64>}, {pipeline_mode = #tpu.pipeline_mode<synchronous>, transform_indices = @transform_9, window_bounds = array<i64: 1, 64>}, {pipeline_mode = #tpu.pipeline_mode<synchronous>, transform_indices = @transform_10, window_bounds = array<i64: 32, 64>}, {pipeline_mode = #tpu.pipeline_mode<synchronous>, transform_indices = @transform_11, window_bounds = array<i64: 1, 64>}, {pipeline_mode = #tpu.pipeline_mode<synchronous>, transform_indices = @transform_12, window_bounds = array<i64: 64, 32>}, {pipeline_mode = #tpu.pipeline_mode<synchronous>, transform_indices = @transform_13, window_bounds = array<i64: 1, 32>}, {pipeline_mode = #tpu.pipeline_mode<synchronous>, transform_indices = @transform_14, window_bounds = array<i64: 1, 32>}, {pipeline_mode = #tpu.pipeline_mode<synchronous>, transform_indices = @transform_15, window_bounds = array<i64: 1, 32>}, {transform_indices = @transform_16, window_bounds = array<i64: 1, 8, 32>}]} {
    %c0 = arith.constant 0 : index
    %c0_0 = arith.constant 0 : index
    %c0_1 = arith.constant 0 : index
    %0 = vector.load %arg3[%c0, %c0_0, %c0_1] : memref<1x8x32xf32, #tpu.memory_space<vmem>>, vector<1x8x32xf32>
    %1 = vector.shape_cast %0 : vector<1x8x32xf32> to vector<8x32xf32>
    %c0_2 = arith.constant 0 : index
    %c0_3 = arith.constant 0 : index
    %c0_4 = arith.constant 0 : index
    %2 = vector.load %arg4[%c0_2, %c0_3, %c0_4] : memref<1x8x32xf32, #tpu.memory_space<vmem>>, vector<1x8x32xf32>
    %3 = vector.shape_cast %2 : vector<1x8x32xf32> to vector<8x32xf32>
    %c0_5 = arith.constant 0 : index
    %c0_6 = arith.constant 0 : index
    %c0_7 = arith.constant 0 : index
    %4 = vector.load %arg5[%c0_5, %c0_6, %c0_7] : memref<1x8x32xf32, #tpu.memory_space<vmem>>, vector<1x8x32xf32>
    %5 = vector.shape_cast %4 : vector<1x8x32xf32> to vector<8x32xf32>
    %6 = arith.truncf %1 : vector<8x32xf32> to vector<8x32xbf16>
    %c0_8 = arith.constant 0 : index
    %c0_9 = arith.constant 0 : index
    %7 = vector.load %arg8[%c0_8, %c0_9] : memref<32x64xbf16, #tpu.memory_space<vmem>>, vector<32x64xbf16>
    %cst = arith.constant dense<0.000000e+00> : vector<8x64xf32>
    %8 = tpu.matmul %6, %7, %cst {dimension_numbers = #tpu.dot_dimension_numbers<[1], [0], [0], [1], [0, 0, 1, 1], [], []>} : vector<8x32xbf16>, vector<32x64xbf16>, vector<8x64xf32> -> vector<8x64xf32>
    %c0_10 = arith.constant 0 : index
    %c0_11 = arith.constant 0 : index
    %9 = vector.load %arg9[%c0_10, %c0_11] : memref<1x64xf32, #tpu.memory_space<vmem>>, vector<1x64xf32>
    %10 = vector.broadcast %9 : vector<1x64xf32> to vector<8x64xf32>
    %11 = arith.addf %8, %10 : vector<8x64xf32>
    %12 = arith.truncf %3 : vector<8x32xf32> to vector<8x32xbf16>
    %c0_12 = arith.constant 0 : index
    %c0_13 = arith.constant 0 : index
    %13 = vector.load %arg10[%c0_12, %c0_13] : memref<32x64xbf16, #tpu.memory_space<vmem>>, vector<32x64xbf16>
    %cst_14 = arith.constant dense<0.000000e+00> : vector<8x64xf32>
    %14 = tpu.matmul %12, %13, %cst_14 {dimension_numbers = #tpu.dot_dimension_numbers<[1], [0], [0], [1], [0, 0, 1, 1], [], []>} : vector<8x32xbf16>, vector<32x64xbf16>, vector<8x64xf32> -> vector<8x64xf32>
    %c0_15 = arith.constant 0 : index
    %c0_16 = arith.constant 0 : index
    %15 = vector.load %arg11[%c0_15, %c0_16] : memref<1x64xf32, #tpu.memory_space<vmem>>, vector<1x64xf32>
    %16 = vector.broadcast %15 : vector<1x64xf32> to vector<8x64xf32>
    %17 = arith.addf %14, %16 : vector<8x64xf32>
    %18 = arith.truncf %5 : vector<8x32xf32> to vector<8x32xbf16>
    %c0_17 = arith.constant 0 : index
    %c0_18 = arith.constant 0 : index
    %19 = vector.load %arg12[%c0_17, %c0_18] : memref<32x64xbf16, #tpu.memory_space<vmem>>, vector<32x64xbf16>
    %cst_19 = arith.constant dense<0.000000e+00> : vector<8x64xf32>
    %20 = tpu.matmul %18, %19, %cst_19 {dimension_numbers = #tpu.dot_dimension_numbers<[1], [0], [0], [1], [0, 0, 1, 1], [], []>} : vector<8x32xbf16>, vector<32x64xbf16>, vector<8x64xf32> -> vector<8x64xf32>
    %c0_20 = arith.constant 0 : index
    %c0_21 = arith.constant 0 : index
    %21 = vector.load %arg13[%c0_20, %c0_21] : memref<1x64xf32, #tpu.memory_space<vmem>>, vector<1x64xf32>
    %22 = vector.broadcast %21 : vector<1x64xf32> to vector<8x64xf32>
    %23 = arith.addf %20, %22 : vector<8x64xf32>
    %24 = arith.truncf %11 : vector<8x64xf32> to vector<8x64xbf16>
    %25 = arith.truncf %17 : vector<8x64xf32> to vector<8x64xbf16>
    %26 = arith.truncf %23 : vector<8x64xf32> to vector<8x64xbf16>
    %27 = vector.extract_strided_slice %24 {offsets = [0, 0], sizes = [8, 8], strides = [1, 1]} : vector<8x64xbf16> to vector<8x8xbf16>
    %28 = vector.extract_strided_slice %24 {offsets = [0, 8], sizes = [8, 8], strides = [1, 1]} : vector<8x64xbf16> to vector<8x8xbf16>
    %29 = vector.extract_strided_slice %24 {offsets = [0, 16], sizes = [8, 8], strides = [1, 1]} : vector<8x64xbf16> to vector<8x8xbf16>
    %30 = vector.extract_strided_slice %24 {offsets = [0, 24], sizes = [8, 8], strides = [1, 1]} : vector<8x64xbf16> to vector<8x8xbf16>
    %31 = vector.shape_cast %27 : vector<8x8xbf16> to vector<1x8x8xbf16>
    %32 = vector.shape_cast %28 : vector<8x8xbf16> to vector<1x8x8xbf16>
    %33 = vector.shape_cast %29 : vector<8x8xbf16> to vector<1x8x8xbf16>
    %34 = vector.shape_cast %30 : vector<8x8xbf16> to vector<1x8x8xbf16>
    %35 = tpu.concatenate %31, %32, %33, %34 in 0 : vector<1x8x8xbf16>, vector<1x8x8xbf16>, vector<1x8x8xbf16>, vector<1x8x8xbf16> -> vector<4x8x8xbf16>
    %36 = vector.extract_strided_slice %24 {offsets = [0, 32], sizes = [8, 8], strides = [1, 1]} : vector<8x64xbf16> to vector<8x8xbf16>
    %37 = vector.extract_strided_slice %24 {offsets = [0, 40], sizes = [8, 8], strides = [1, 1]} : vector<8x64xbf16> to vector<8x8xbf16>
    %38 = vector.extract_strided_slice %24 {offsets = [0, 48], sizes = [8, 8], strides = [1, 1]} : vector<8x64xbf16> to vector<8x8xbf16>
    %39 = vector.extract_strided_slice %24 {offsets = [0, 56], sizes = [8, 8], strides = [1, 1]} : vector<8x64xbf16> to vector<8x8xbf16>
    %40 = vector.shape_cast %36 : vector<8x8xbf16> to vector<1x8x8xbf16>
    %41 = vector.shape_cast %37 : vector<8x8xbf16> to vector<1x8x8xbf16>
    %42 = vector.shape_cast %38 : vector<8x8xbf16> to vector<1x8x8xbf16>
    %43 = vector.shape_cast %39 : vector<8x8xbf16> to vector<1x8x8xbf16>
    %44 = tpu.concatenate %40, %41, %42, %43 in 0 : vector<1x8x8xbf16>, vector<1x8x8xbf16>, vector<1x8x8xbf16>, vector<1x8x8xbf16> -> vector<4x8x8xbf16>
    %45 = vector.extract_strided_slice %25 {offsets = [0, 0], sizes = [8, 8], strides = [1, 1]} : vector<8x64xbf16> to vector<8x8xbf16>
    %46 = vector.extract_strided_slice %25 {offsets = [0, 8], sizes = [8, 8], strides = [1, 1]} : vector<8x64xbf16> to vector<8x8xbf16>
    %47 = vector.extract_strided_slice %25 {offsets = [0, 16], sizes = [8, 8], strides = [1, 1]} : vector<8x64xbf16> to vector<8x8xbf16>
    %48 = vector.extract_strided_slice %25 {offsets = [0, 24], sizes = [8, 8], strides = [1, 1]} : vector<8x64xbf16> to vector<8x8xbf16>
    %49 = vector.shape_cast %45 : vector<8x8xbf16> to vector<1x8x8xbf16>
    %50 = vector.shape_cast %46 : vector<8x8xbf16> to vector<1x8x8xbf16>
    %51 = vector.shape_cast %47 : vector<8x8xbf16> to vector<1x8x8xbf16>
    %52 = vector.shape_cast %48 : vector<8x8xbf16> to vector<1x8x8xbf16>
    %53 = tpu.concatenate %49, %50, %51, %52 in 0 : vector<1x8x8xbf16>, vector<1x8x8xbf16>, vector<1x8x8xbf16>, vector<1x8x8xbf16> -> vector<4x8x8xbf16>
    %54 = vector.extract_strided_slice %25 {offsets = [0, 32], sizes = [8, 8], strides = [1, 1]} : vector<8x64xbf16> to vector<8x8xbf16>
    %55 = vector.extract_strided_slice %25 {offsets = [0, 40], sizes = [8, 8], strides = [1, 1]} : vector<8x64xbf16> to vector<8x8xbf16>
    %56 = vector.extract_strided_slice %25 {offsets = [0, 48], sizes = [8, 8], strides = [1, 1]} : vector<8x64xbf16> to vector<8x8xbf16>
    %57 = vector.extract_strided_slice %25 {offsets = [0, 56], sizes = [8, 8], strides = [1, 1]} : vector<8x64xbf16> to vector<8x8xbf16>
    %58 = vector.shape_cast %54 : vector<8x8xbf16> to vector<1x8x8xbf16>
    %59 = vector.shape_cast %55 : vector<8x8xbf16> to vector<1x8x8xbf16>
    %60 = vector.shape_cast %56 : vector<8x8xbf16> to vector<1x8x8xbf16>
    %61 = vector.shape_cast %57 : vector<8x8xbf16> to vector<1x8x8xbf16>
    %62 = tpu.concatenate %58, %59, %60, %61 in 0 : vector<1x8x8xbf16>, vector<1x8x8xbf16>, vector<1x8x8xbf16>, vector<1x8x8xbf16> -> vector<4x8x8xbf16>
    %63 = vector.extract_strided_slice %26 {offsets = [0, 0], sizes = [8, 8], strides = [1, 1]} : vector<8x64xbf16> to vector<8x8xbf16>
    %64 = vector.extract_strided_slice %26 {offsets = [0, 8], sizes = [8, 8], strides = [1, 1]} : vector<8x64xbf16> to vector<8x8xbf16>
    %65 = vector.extract_strided_slice %26 {offsets = [0, 16], sizes = [8, 8], strides = [1, 1]} : vector<8x64xbf16> to vector<8x8xbf16>
    %66 = vector.extract_strided_slice %26 {offsets = [0, 24], sizes = [8, 8], strides = [1, 1]} : vector<8x64xbf16> to vector<8x8xbf16>
    %67 = vector.shape_cast %63 : vector<8x8xbf16> to vector<1x8x8xbf16>
    %68 = vector.shape_cast %64 : vector<8x8xbf16> to vector<1x8x8xbf16>
    %69 = vector.shape_cast %65 : vector<8x8xbf16> to vector<1x8x8xbf16>
    %70 = vector.shape_cast %66 : vector<8x8xbf16> to vector<1x8x8xbf16>
    %71 = tpu.concatenate %67, %68, %69, %70 in 0 : vector<1x8x8xbf16>, vector<1x8x8xbf16>, vector<1x8x8xbf16>, vector<1x8x8xbf16> -> vector<4x8x8xbf16>
    %72 = vector.extract_strided_slice %26 {offsets = [0, 32], sizes = [8, 8], strides = [1, 1]} : vector<8x64xbf16> to vector<8x8xbf16>
    %73 = vector.extract_strided_slice %26 {offsets = [0, 40], sizes = [8, 8], strides = [1, 1]} : vector<8x64xbf16> to vector<8x8xbf16>
    %74 = vector.extract_strided_slice %26 {offsets = [0, 48], sizes = [8, 8], strides = [1, 1]} : vector<8x64xbf16> to vector<8x8xbf16>
    %75 = vector.extract_strided_slice %26 {offsets = [0, 56], sizes = [8, 8], strides = [1, 1]} : vector<8x64xbf16> to vector<8x8xbf16>
    %76 = vector.shape_cast %72 : vector<8x8xbf16> to vector<1x8x8xbf16>
    %77 = vector.shape_cast %73 : vector<8x8xbf16> to vector<1x8x8xbf16>
    %78 = vector.shape_cast %74 : vector<8x8xbf16> to vector<1x8x8xbf16>
    %79 = vector.shape_cast %75 : vector<8x8xbf16> to vector<1x8x8xbf16>
    %80 = tpu.concatenate %76, %77, %78, %79 in 0 : vector<1x8x8xbf16>, vector<1x8x8xbf16>, vector<1x8x8xbf16>, vector<1x8x8xbf16> -> vector<4x8x8xbf16>
    %c0_22 = arith.constant 0 : index
    %c0_23 = arith.constant 0 : index
    %81 = vector.load %arg2[%c0_22, %c0_23] : memref<8x8xf32, #tpu.memory_space<vmem>>, vector<8x8xf32>
    %c0_24 = arith.constant 0 : index
    %c0_25 = arith.constant 0 : index
    %c0_26 = arith.constant 0 : index
    %82 = vector.load %arg6[%c0_24, %c0_25, %c0_26] : memref<1x1x8xf32, #tpu.memory_space<vmem>>, vector<1x1x8xf32>
    %83 = vector.shape_cast %82 : vector<1x1x8xf32> to vector<1x8xf32>
    %84 = vector.broadcast %83 : vector<1x8xf32> to vector<8x8xf32>
    %85 = arith.addf %81, %84 : vector<8x8xf32>
    %c0_27 = arith.constant 0 : index
    %c0_28 = arith.constant 0 : index
    %c0_29 = arith.constant 0 : index
    %86 = vector.load %arg7[%c0_27, %c0_28, %c0_29] : memref<1x1x8xf32, #tpu.memory_space<vmem>>, vector<1x1x8xf32>
    %87 = vector.shape_cast %86 : vector<1x1x8xf32> to vector<1x8xf32>
    "tpu.trace_start"() <{level = 10 : i32, message = "hqd,hkd->hqk"}> : () -> ()
    %cst_30 = arith.constant dense<0.000000e+00> : vector<4x8x8xf32>
    %88 = tpu.matmul %35, %53, %cst_30 {dimension_numbers = #tpu.dot_dimension_numbers<[2], [2], [1], [1], [0, 0, 0, 1, 1, 1], [0], [0]>} : vector<4x8x8xbf16>, vector<4x8x8xbf16>, vector<4x8x8xf32> -> vector<4x8x8xf32>
    "tpu.trace_stop"() : () -> ()
    %89 = vector.shape_cast %85 : vector<8x8xf32> to vector<1x8x8xf32>
    %90 = vector.broadcast %89 : vector<1x8x8xf32> to vector<4x8x8xf32>
    %91 = arith.addf %88, %90 : vector<4x8x8xf32>
    %cst_31 = arith.constant dense<0xFF800000> : vector<4x8xf32>
    %92 = vector.multi_reduction <maximumf>, %91, %cst_31 [2] : vector<4x8x8xf32> to vector<4x8xf32>
    %93 = vector.shape_cast %92 : vector<4x8xf32> to vector<4x8x1xf32>
    %94 = vector.broadcast %93 : vector<4x8x1xf32> to vector<4x8x8xf32>
    %95 = arith.subf %91, %94 : vector<4x8x8xf32>
    %96 = math.exp %95 : vector<4x8x8xf32>
    %cst_32 = arith.constant dense<0.000000e+00> : vector<4x8xf32>
    %97 = vector.multi_reduction <add>, %96, %cst_32 [2] : vector<4x8x8xf32> to vector<4x8xf32>
    %98 = vector.shape_cast %97 : vector<4x8xf32> to vector<4x8x1xf32>
    %99 = tpu.reciprocal %98 {approx = true} : vector<4x8x1xf32> -> vector<4x8x1xf32>
    %100 = vector.broadcast %99 : vector<4x8x1xf32> to vector<4x8x8xf32>
    %101 = arith.mulf %96, %100 : vector<4x8x8xf32>
    %102 = arith.truncf %101 : vector<4x8x8xf32> to vector<4x8x8xbf16>
    "tpu.trace_start"() <{level = 10 : i32, message = "hqk,hkd->hqd"}> : () -> ()
    %cst_33 = arith.constant dense<0.000000e+00> : vector<4x8x8xf32>
    %103 = tpu.matmul %102, %62, %cst_33 {dimension_numbers = #tpu.dot_dimension_numbers<[2], [1], [1], [2], [0, 0, 0, 1, 1, 2], [0], [0]>} : vector<4x8x8xbf16>, vector<4x8x8xbf16>, vector<4x8x8xf32> -> vector<4x8x8xf32>
    "tpu.trace_stop"() : () -> ()
    "tpu.trace_start"() <{level = 10 : i32, message = "hqd,hkd->hqk"}> : () -> ()
    %cst_34 = arith.constant dense<0.000000e+00> : vector<4x8x8xf32>
    %104 = tpu.matmul %44, %71, %cst_34 {dimension_numbers = #tpu.dot_dimension_numbers<[2], [2], [1], [1], [0, 0, 0, 1, 1, 1], [0], [0]>} : vector<4x8x8xbf16>, vector<4x8x8xbf16>, vector<4x8x8xf32> -> vector<4x8x8xf32>
    "tpu.trace_stop"() : () -> ()
    %105 = vector.shape_cast %87 : vector<1x8xf32> to vector<1x1x8xf32>
    %106 = vector.broadcast %105 : vector<1x1x8xf32> to vector<4x8x8xf32>
    %107 = arith.addf %104, %106 : vector<4x8x8xf32>
    %cst_35 = arith.constant dense<0xFF800000> : vector<4x8xf32>
    %108 = vector.multi_reduction <maximumf>, %107, %cst_35 [2] : vector<4x8x8xf32> to vector<4x8xf32>
    %109 = vector.shape_cast %108 : vector<4x8xf32> to vector<4x8x1xf32>
    %110 = vector.broadcast %109 : vector<4x8x1xf32> to vector<4x8x8xf32>
    %111 = arith.subf %107, %110 : vector<4x8x8xf32>
    %112 = math.exp %111 : vector<4x8x8xf32>
    %cst_36 = arith.constant dense<0.000000e+00> : vector<4x8xf32>
    %113 = vector.multi_reduction <add>, %112, %cst_36 [2] : vector<4x8x8xf32> to vector<4x8xf32>
    %114 = vector.shape_cast %113 : vector<4x8xf32> to vector<4x8x1xf32>
    %115 = tpu.reciprocal %114 {approx = true} : vector<4x8x1xf32> -> vector<4x8x1xf32>
    %116 = vector.broadcast %115 : vector<4x8x1xf32> to vector<4x8x8xf32>
    %117 = arith.mulf %112, %116 : vector<4x8x8xf32>
    %118 = arith.truncf %117 : vector<4x8x8xf32> to vector<4x8x8xbf16>
    "tpu.trace_start"() <{level = 10 : i32, message = "hqk,hkd->hqd"}> : () -> ()
    %cst_37 = arith.constant dense<0.000000e+00> : vector<4x8x8xf32>
    %119 = tpu.matmul %118, %80, %cst_37 {dimension_numbers = #tpu.dot_dimension_numbers<[2], [1], [1], [2], [0, 0, 0, 1, 1, 2], [0], [0]>} : vector<4x8x8xbf16>, vector<4x8x8xbf16>, vector<4x8x8xf32> -> vector<4x8x8xf32>
    "tpu.trace_stop"() : () -> ()
    %120 = vector.extract_strided_slice %103 {offsets = [0, 0, 0], sizes = [1, 8, 8], strides = [1, 1, 1]} : vector<4x8x8xf32> to vector<1x8x8xf32>
    %121 = vector.shape_cast %120 : vector<1x8x8xf32> to vector<8x8xf32>
    %122 = vector.extract_strided_slice %103 {offsets = [1, 0, 0], sizes = [1, 8, 8], strides = [1, 1, 1]} : vector<4x8x8xf32> to vector<1x8x8xf32>
    %123 = vector.shape_cast %122 : vector<1x8x8xf32> to vector<8x8xf32>
    %124 = vector.extract_strided_slice %103 {offsets = [2, 0, 0], sizes = [1, 8, 8], strides = [1, 1, 1]} : vector<4x8x8xf32> to vector<1x8x8xf32>
    %125 = vector.shape_cast %124 : vector<1x8x8xf32> to vector<8x8xf32>
    %126 = vector.extract_strided_slice %103 {offsets = [3, 0, 0], sizes = [1, 8, 8], strides = [1, 1, 1]} : vector<4x8x8xf32> to vector<1x8x8xf32>
    %127 = vector.shape_cast %126 : vector<1x8x8xf32> to vector<8x8xf32>
    %128 = vector.extract_strided_slice %119 {offsets = [0, 0, 0], sizes = [1, 8, 8], strides = [1, 1, 1]} : vector<4x8x8xf32> to vector<1x8x8xf32>
    %129 = vector.shape_cast %128 : vector<1x8x8xf32> to vector<8x8xf32>
    %130 = vector.extract_strided_slice %119 {offsets = [1, 0, 0], sizes = [1, 8, 8], strides = [1, 1, 1]} : vector<4x8x8xf32> to vector<1x8x8xf32>
    %131 = vector.shape_cast %130 : vector<1x8x8xf32> to vector<8x8xf32>
    %132 = vector.extract_strided_slice %119 {offsets = [2, 0, 0], sizes = [1, 8, 8], strides = [1, 1, 1]} : vector<4x8x8xf32> to vector<1x8x8xf32>
    %133 = vector.shape_cast %132 : vector<1x8x8xf32> to vector<8x8xf32>
    %134 = vector.extract_strided_slice %119 {offsets = [3, 0, 0], sizes = [1, 8, 8], strides = [1, 1, 1]} : vector<4x8x8xf32> to vector<1x8x8xf32>
    %135 = vector.shape_cast %134 : vector<1x8x8xf32> to vector<8x8xf32>
    %136 = tpu.concatenate %121, %123, %125, %127, %129, %131, %133, %135 in 1 : vector<8x8xf32>, vector<8x8xf32>, vector<8x8xf32>, vector<8x8xf32>, vector<8x8xf32>, vector<8x8xf32>, vector<8x8xf32>, vector<8x8xf32> -> vector<8x64xf32>
    %137 = arith.truncf %136 : vector<8x64xf32> to vector<8x64xbf16>
    %c0_38 = arith.constant 0 : index
    %c0_39 = arith.constant 0 : index
    %138 = vector.load %arg14[%c0_38, %c0_39] : memref<64x32xbf16, #tpu.memory_space<vmem>>, vector<64x32xbf16>
    %cst_40 = arith.constant dense<0.000000e+00> : vector<8x32xf32>
    %139 = tpu.matmul %137, %138, %cst_40 {dimension_numbers = #tpu.dot_dimension_numbers<[1], [0], [0], [1], [0, 0, 1, 1], [], []>} : vector<8x64xbf16>, vector<64x32xbf16>, vector<8x32xf32> -> vector<8x32xf32>
    %c0_41 = arith.constant 0 : index
    %c0_42 = arith.constant 0 : index
    %140 = vector.load %arg15[%c0_41, %c0_42] : memref<1x32xf32, #tpu.memory_space<vmem>>, vector<1x32xf32>
    %141 = vector.broadcast %140 : vector<1x32xf32> to vector<8x32xf32>
    %142 = arith.addf %139, %141 : vector<8x32xf32>
    %143 = arith.addf %142, %1 : vector<8x32xf32>
    %cst_43 = arith.constant dense<0.000000e+00> : vector<8xf32>
    %144 = vector.multi_reduction <add>, %143, %cst_43 [1] : vector<8x32xf32> to vector<8xf32>
    %145 = vector.shape_cast %144 : vector<8xf32> to vector<8x1xf32>
    %cst_44 = arith.constant 3.200000e+01 : f32
    %146 = vector.broadcast %cst_44 : f32 to vector<8x1xf32>
    %147 = arith.divf %145, %146 : vector<8x1xf32>
    %148 = vector.broadcast %147 : vector<8x1xf32> to vector<8x32xf32>
    %149 = arith.subf %143, %148 : vector<8x32xf32>
    %150 = arith.mulf %149, %149 : vector<8x32xf32>
    %cst_45 = arith.constant dense<0.000000e+00> : vector<8xf32>
    %151 = vector.multi_reduction <add>, %150, %cst_45 [1] : vector<8x32xf32> to vector<8xf32>
    %152 = vector.shape_cast %151 : vector<8xf32> to vector<8x1xf32>
    %cst_46 = arith.constant 3.200000e+01 : f32
    %153 = vector.broadcast %cst_46 : f32 to vector<8x1xf32>
    %154 = arith.divf %152, %153 : vector<8x1xf32>
    %155 = vector.broadcast %147 : vector<8x1xf32> to vector<8x32xf32>
    %156 = arith.subf %143, %155 : vector<8x32xf32>
    %cst_47 = arith.constant 9.99999974E-6 : f32
    %157 = vector.broadcast %cst_47 : f32 to vector<8x1xf32>
    %158 = arith.addf %154, %157 : vector<8x1xf32>
    %159 = math.rsqrt %158 : vector<8x1xf32>
    %160 = vector.broadcast %159 : vector<8x1xf32> to vector<8x32xf32>
    %161 = arith.mulf %156, %160 : vector<8x32xf32>
    %c0_48 = arith.constant 0 : index
    %c0_49 = arith.constant 0 : index
    %162 = vector.load %arg16[%c0_48, %c0_49] : memref<1x32xf32, #tpu.memory_space<vmem>>, vector<1x32xf32>
    %163 = vector.broadcast %162 : vector<1x32xf32> to vector<8x32xf32>
    %164 = arith.mulf %161, %163 : vector<8x32xf32>
    %c0_50 = arith.constant 0 : index
    %c0_51 = arith.constant 0 : index
    %165 = vector.load %arg17[%c0_50, %c0_51] : memref<1x32xf32, #tpu.memory_space<vmem>>, vector<1x32xf32>
    %166 = vector.broadcast %165 : vector<1x32xf32> to vector<8x32xf32>
    %167 = arith.addf %164, %166 : vector<8x32xf32>
    %c0_52 = arith.constant 0 : index
    %c0_53 = arith.constant 0 : index
    %c0_54 = arith.constant 0 : index
    %168 = vector.load %arg18[%c0_52, %c0_53, %c0_54] : memref<1x8x32xf32, #tpu.memory_space<vmem>>, vector<1x8x32xf32>
    %169 = vector.shape_cast %168 : vector<1x8x32xf32> to vector<8x32xf32>
    %170 = vector.shape_cast %167 : vector<8x32xf32> to vector<1x8x32xf32>
    tpu.vector_store %arg18[%c0_52, %c0_53, %c0_54], %170 {strides = array<i32>} : memref<1x8x32xf32, #tpu.memory_space<vmem>>, vector<1x8x32xf32>,
    return
  }
  func.func @transform_0(%arg0: i32, %arg1: i32) -> (i32, i32) {
    %c0_i32 = arith.constant 0 : i32
    %c0_i32_0 = arith.constant 0 : i32
    return %arg1, %c0_i32 : i32, i32
  }
  func.func @transform_1(%arg0: i32, %arg1: i32) -> (i32, i32, i32) {
    %c0_i32 = arith.constant 0 : i32
    %c0_i32_0 = arith.constant 0 : i32
    return %arg0, %arg1, %c0_i32 : i32, i32, i32
  }
  func.func @transform_2(%arg0: i32, %arg1: i32) -> (i32, i32, i32) {
    %c0_i32 = arith.constant 0 : i32
    %c0_i32_0 = arith.constant 0 : i32
    %c0_i32_1 = arith.constant 0 : i32
    return %arg0, %c0_i32, %c0_i32_0 : i32, i32, i32
  }
  func.func @transform_3(%arg0: i32, %arg1: i32) -> (i32, i32, i32) {
    %c0_i32 = arith.constant 0 : i32
    %c0_i32_0 = arith.constant 0 : i32
    %c0_i32_1 = arith.constant 0 : i32
    return %arg0, %c0_i32, %c0_i32_0 : i32, i32, i32
  }
  func.func @transform_4(%arg0: i32, %arg1: i32) -> (i32, i32, i32) {
    %c0_i32 = arith.constant 0 : i32
    %c0_i32_0 = arith.constant 0 : i32
    %c0_i32_1 = arith.constant 0 : i32
    return %arg0, %c0_i32, %c0_i32_0 : i32, i32, i32
  }
  func.func @transform_5(%arg0: i32, %arg1: i32) -> (i32, i32, i32) {
    %c0_i32 = arith.constant 0 : i32
    %c0_i32_0 = arith.constant 0 : i32
    %c0_i32_1 = arith.constant 0 : i32
    return %arg0, %c0_i32, %c0_i32_0 : i32, i32, i32
  }
  func.func @transform_6(%arg0: i32, %arg1: i32) -> (i32, i32) {
    %c0_i32 = arith.constant 0 : i32
    %c0_i32_0 = arith.constant 0 : i32
    %c0_i32_1 = arith.constant 0 : i32
    return %c0_i32, %c0_i32_0 : i32, i32
  }
  func.func @transform_7(%arg0: i32, %arg1: i32) -> (i32, i32) {
    %c0_i32 = arith.constant 0 : i32
    %c0_i32_0 = arith.constant 0 : i32
    %c0_i32_1 = arith.constant 0 : i32
    return %c0_i32, %c0_i32_0 : i32, i32
  }
  func.func @transform_8(%arg0: i32, %arg1: i32) -> (i32, i32) {
    %c0_i32 = arith.constant 0 : i32
    %c0_i32_0 = arith.constant 0 : i32
    %c0_i32_1 = arith.constant 0 : i32
    return %c0_i32, %c0_i32_0 : i32, i32
  }
  func.func @transform_9(%arg0: i32, %arg1: i32) -> (i32, i32) {
    %c0_i32 = arith.constant 0 : i32
    %c0_i32_0 = arith.constant 0 : i32
    %c0_i32_1 = arith.constant 0 : i32
    return %c0_i32, %c0_i32_0 : i32, i32
  }
  func.func @transform_10(%arg0: i32, %arg1: i32) -> (i32, i32) {
    %c0_i32 = arith.constant 0 : i32
    %c0_i32_0 = arith.constant 0 : i32
    %c0_i32_1 = arith.constant 0 : i32
    return %c0_i32, %c0_i32_0 : i32, i32
  }
  func.func @transform_11(%arg0: i32, %arg1: i32) -> (i32, i32) {
    %c0_i32 = arith.constant 0 : i32
    %c0_i32_0 = arith.constant 0 : i32
    %c0_i32_1 = arith.constant 0 : i32
    return %c0_i32, %c0_i32_0 : i32, i32
  }
  func.func @transform_12(%arg0: i32, %arg1: i32) -> (i32, i32) {
    %c0_i32 = arith.constant 0 : i32
    %c0_i32_0 = arith.constant 0 : i32
    %c0_i32_1 = arith.constant 0 : i32
    return %c0_i32, %c0_i32_0 : i32, i32
  }
  func.func @transform_13(%arg0: i32, %arg1: i32) -> (i32, i32) {
    %c0_i32 = arith.constant 0 : i32
    %c0_i32_0 = arith.constant 0 : i32
    %c0_i32_1 = arith.constant 0 : i32
    return %c0_i32, %c0_i32_0 : i32, i32
  }
  func.func @transform_14(%arg0: i32, %arg1: i32) -> (i32, i32) {
    %c0_i32 = arith.constant 0 : i32
    %c0_i32_0 = arith.constant 0 : i32
    %c0_i32_1 = arith.constant 0 : i32
    return %c0_i32, %c0_i32_0 : i32, i32
  }
  func.func @transform_15(%arg0: i32, %arg1: i32) -> (i32, i32) {
    %c0_i32 = arith.constant 0 : i32
    %c0_i32_0 = arith.constant 0 : i32
    %c0_i32_1 = arith.constant 0 : i32
    return %c0_i32, %c0_i32_0 : i32, i32
  }
  func.func @transform_16(%arg0: i32, %arg1: i32) -> (i32, i32, i32) {
    %c0_i32 = arith.constant 0 : i32
    %c0_i32_0 = arith.constant 0 : i32
    return %arg0, %arg1, %c0_i32 : i32, i32, i32
  }
}

</mosaic_0001>

<bundles_post_ra>
// kernel: tpu_custom_call.1
= control target key start
LH: loop header
LB: loop body
LE: loop exit
PB: predicated region body
PF: predicated region fallthrough
CT: control target
= control target key end

     0   :  { %s3359_s0 = inlined_call_operand.hbm [shape: f32[8,8], index: 0, kind: input, shape index: {}]   ;;  %s3360_s1 = inlined_call_operand.vmem [shape: f32[2,8,32], index: 1, kind: input, shape index: {}]   ;;  %s3361_s2 = inlined_call_operand.vmem [shape: f32[2,8,32], index: 2, kind: input, shape index: {}]   ;;  %s3362_s3 = inlined_call_operand.vmem [shape: f32[2,8,32], index: 3, kind: input, shape index: {}]   ;;  %s3363_s4 = inlined_call_operand.vmem [shape: f32[2,1,8], index: 4, kind: input, shape index: {}]   ;;  %s3364_s5 = inlined_call_operand.vmem [shape: f32[2,1,8], index: 5, kind: input, shape index: {}]   ;;  %s3365_s6 = inlined_call_operand.hbm [shape: bf16[32,64], index: 6, kind: input, shape index: {}]   ;;  %s3366_s7 = inlined_call_operand.vmem [shape: f32[1,64], index: 7, kind: input, shape index: {}]   ;;  %s3367_s8 = inlined_call_operand.hbm [shape: bf16[32,64], index: 8, kind: input, shape index: {}]   ;;  %s3368_s9 = inlined_call_operand.hbm [shape: f32[1,64], index: 9, kind: input, shape index: {}]   ;;  %s3369_s10 = inlined_call_operand.hbm [shape: bf16[32,64], index: 10, kind: input, shape index: {}]   ;;  %s3370_s11 = inlined_call_operand.hbm [shape: f32[1,64], index: 11, kind: input, shape index: {}]   ;;  %s3371_s12 = inlined_call_operand.vmem [shape: bf16[64,32], index: 12, kind: input, shape index: {}]   ;;  %s3372_s13 = inlined_call_operand.vmem [shape: f32[1,32], index: 13, kind: input, shape index: {}]   ;;  %s3373_s14 = inlined_call_operand.vmem [shape: f32[1,32], index: 14, kind: input, shape index: {}]   ;;  %s3374_s15 = inlined_call_operand.vmem [shape: f32[1,32], index: 15, kind: input, shape index: {}]   ;;  %s3375_s16 = inlined_call_operand.hbm [shape: f32[2,8,32], index: 16, kind: output, shape index: {}]  }
   0x1   :  { %3392 = sst [smem:[#allocation26_spill]] %s3359_s0 }
   0x2   :  { %3393 = sst [smem:[#allocation27_spill]] %s3360_s1 }
   0x3   :  { %3394 = sst [smem:[#allocation28_spill]] %s3365_s6 }
   0x4   :  { %3395 = sst [smem:[#allocation29_spill]] %s3374_s15 }
   0x5   :  { %3396 = sst [smem:[#allocation30_spill]] %s3375_s16 }
   0x6   :  { %21 = vsyncpa [#allocation3], 0 }
   0x7   :  { %22 = vsyncpa [#allocation6], 0 }
   0x8   :  { %23 = vsyncpa [#allocation9], 0 }
   0x9   :  { %24 = vsyncpa [#allocation12], 0 }
   0xa   :  { %25 = vsyncpa [#allocation4], 0 }
   0xb   :  { %27 = vsyncpa [#allocation4 + $0x1], 0  ;;  %s2916_s21 = smov 0   ;;  %s2918_s22 = smov 0  }
   0xc   :  { %s2920_s23 = smov 0   ;;  %s2922_s24 = smov 0  }
   0xd   :  { %s2924_s25 = smov 0   ;;  %s2926_s26 = smov 0  }
   0xe LB: > { %3397 = sst [smem:[#allocation19_spill]] %s2787_s21  ;;  %s2143_s27 = sadd.s32 4294967295, %s2807_s26   ;;  %s2807_s26 = sphi %s2926_s26, %s33_s26   ;;  %s2803_s25 = sphi %s2924_s25, %s3428_s25   ;;  %s2799_s24 = sphi %s2922_s24, %s3427_s24   ;;  %s2795_s23 = sphi %s2920_s23, %s3426_s23   ;;  %s2791_s22 = sphi %s2918_s22, %s3430_s22   ;;  %s2787_s21 = sphi %s2916_s21, %s3429_s21  }
   0xf   : > { %3398 = sst [smem:[#allocation20_spill]] %s2795_s23  ;;  %s2144_s28 = sadd.s32 4294967294, %s2807_s26  }
  0x10   : > { %3399 = sst [smem:[#allocation21_spill]] %s2803_s25  ;;  %s45_s29 = sadd.s32 1, %s2803_s25 }
  0x11   : > { %3400 = sst [smem:[#allocation22_spill]] %s2807_s26  ;;  %s422_s30 = sadd.s32 1, %s2795_s23 }
  0x12   : > { %p47_p0 = scmp.ge.s32.totalorder %s45_s29, 2  ;;  %p432_p1 = scmp.ne.s32.totalorder %s2795_s23, %s2791_s22 }
  0x13   : > { %p433_p2 = scmp.eq.s32.totalorder %s2143_s27, 1  ;;  %p438_p3 = scmp.ne.s32.totalorder %s2791_s22, %s2787_s21 }
  0x14   : > { %s3432_s29 = smov (%p47_p0, %s45_s29), 0  ;;  %p439_p5 = scmp.eq.s32.totalorder %s2144_s28, 1 }
  0x15   : > { %3401 = sst [smem:[#allocation23_spill]] %s3432_s29  ;;  %p2956_p4 = por %p433_p2, %p432_p1 }
  0x16   : > { %s417_s17 = ssub.s32 %s2803_s25, %s3432_s29  ;;  %p2145_p6 = scmp.ge.s32.totalorder %s2807_s26, 1 }
  0x17   : > { %s3402_s0 = scalar_select %p2956_p4, 1, 0 }
  0x18   : > { %p420_p7 = scmp.eq.s32.totalorder %s417_s17, 0  ;;  %p2963_p8 = por %p439_p5, %p438_p3 }
  0x19   : > { %p446_p9 = scmp.lt.s32.totalorder %s2807_s26, 3  ;;  %p2975_p11 = scmp.eq.s32.totalorder %s2143_s27, 0 }
  0x1a   : > { %s3403_s18 = scalar_select %p2963_p8, 1, 0 }
  0x1b   : > { %s2969_s19 = scalar_select %p420_p7, %s2795_s23, %s422_s30  }
  0x1c   : > { %3404 = sst [smem:[#allocation24_spill]] %s3403_s18  ;;  %p2971_p10 = pnand %p2145_p6, %p446_p9 }
  0x1d   : > { %3405 = sst [smem:[#allocation25_spill]] %s2969_s19  ;;  %s2809_s28 = smov [#allocation5]  }
  0x1e   : > { %s3406_s20 = scalar_select %p2971_p10, 1, 0 }
  0x1f   : > { %s3407_s21 = scalar_select %p2975_p11, 1, 0 }
  0x20   : > { %p2410_p12 = pneg %p2971_p10  ;;  %s471_s17 = sshll.u32 %s2809_s28, 4  ;;  %s472_s17 = int_to_ptr.vmem [resolvable:$true] %s471_s17 }
  0x21   : > { %s2810_s30 = smov [#allocation8]   ;;  %s2570_s19 = scalar_lea.vmem %s472_s17, 256 }
  0x22   : > { %p2983_p13 = pnand %p2975_p11, %p2410_p12  ;;  %s501_s25 = sshll.u32 %s2810_s30, 4  ;;  %s502_s25 = int_to_ptr.vmem [resolvable:$true] %s501_s25 }
  0x23   : > { %p2571_p1 = scmp.ne.s32.totalorder %s472_s17, %s2570_s19  ;;  %p2578_p5 = scmp.lt.s32.totalorder %s472_s17, %s472_s17 }
  0x24   : > { %p2989_p0 = pneg %p2983_p13  ;;  %p2579_p6 = scmp.lt.s32.totalorder %s2570_s19, %s2570_s19 }
  0x26   : > { %p2573_p2 = pnand %p2571_p1, %p2989_p0  ;;  %p2580_p7 = por %p2579_p6, %p2578_p5 }
  0x28   : > { %p2574_p3 = pneg %p2573_p2 }
  0x2a   : > { %p2581_p9 = pnand %p2580_p7, %p2574_p3 }
  0x2c   : > { %2584 = shalt.err (!%p2581_p9)
}
  0x2d   : > { %s3384_s28 = smov 64   ;;  %s3386_s30 = smov 4  }
  0x2e   : > { %s3410_s6 = sld [smem:[#allocation28_spill]]  ;;  %s2596_s26 = scalar_lea.vmem %s502_s25, 16 }
  0x2f   : > { %p2597_p12 = scmp.ne.s32.totalorder %s502_s25, %s2596_s26  ;;  %s2603_s19 = scalar_lea.vmem %s502_s25, 32 }
  0x30   : > { %p2604_p3 = scmp.lt.s32.totalorder %s502_s25, %s502_s25  ;;  %p2605_p5 = scmp.lt.s32.totalorder %s2603_s19, %s2596_s26 }
  0x31   : > { %p2599_p1 = pnand %p2597_p12, %p2989_p0 }
  0x32   : > { %p2606_p6 = por %p2605_p5, %p2604_p3 }
  0x33   : > { %p2600_p2 = pneg %p2599_p1 }
  0x34   : > { %2416 = dma.hbm_to_vmem [thread:$0]  (!%p2983_p13), %s3410_s6, 256, %s472_s17, [#allocation6], %s3384_s28, %s3384_s28, %s3386_s30  }
  0x35   : > { %p2607_p7 = pnand %p2606_p6, %p2600_p2 }
  0x37   : > { %2610 = shalt.err (!%p2607_p7)
}
  0x38   : > { %2422 = dma.hbm_to_vmem [thread:$0]  (!%p2983_p13), %s3368_s9, 16, %s502_s25, [#allocation9]  }
  0x39   : > { %s2813_s23 = smov [#allocation2]   ;;  %s2814_s17 = smov [#allocation7]  }
  0x3a   : > { %s461_s18 = sshll.u32 %s2813_s23, 4  ;;  %s487_s28 = sshll.u32 %s2814_s17, 4  ;;  %s462_s18 = int_to_ptr.vmem [resolvable:$true] %s461_s18  ;;  %s488_s28 = int_to_ptr.vmem [resolvable:$true] %s487_s28 }
  0x3b   : > { %s2622_s30 = scalar_lea.vmem %s462_s18, 128  ;;  %p2630_p3 = scmp.lt.s32.totalorder %s462_s18, %s462_s18 }
  0x3c   : > { %p2623_p9 = scmp.ne.s32.totalorder %s462_s18, %s2622_s30  ;;  %p2631_p2 = scmp.lt.s32.totalorder %s2622_s30, %s2622_s30 }
  0x3e   : > { %p2625_p12 = pnand %p2623_p9, %p2989_p0  ;;  %p2632_p5 = por %p2631_p2, %p2630_p3 }
  0x40   : > { %p2626_p1 = pneg %p2625_p12 }
  0x42   : > { %p2633_p6 = pnand %p2632_p5, %p2626_p1 }
  0x44   : > { %2636 = shalt.err (!%p2633_p6)
}
  0x45   : > { %s3411_s25 = sld [smem:[#allocation26_spill]]  ;;  %s2648_s26 = scalar_lea.vmem %s488_s28, 256 }
  0x46   : > { %p2649_p7 = scmp.ne.s32.totalorder %s488_s28, %s2648_s26  ;;  %p2656_p9 = scmp.lt.s32.totalorder %s488_s28, %s488_s28 }
  0x47   : > { %p2657_p12 = scmp.lt.s32.totalorder %s2648_s26, %s2648_s26 }
  0x48   : > { %p2651_p8 = pnand %p2649_p7, %p2989_p0 }
  0x49   : > { %p2658_p11 = por %p2657_p12, %p2656_p9 }
  0x4a   : > { %p2652_p4 = pneg %p2651_p8 }
  0x4b   : > { %2413 = dma.hbm_to_vmem [thread:$0]  (!%p2983_p13), %s3411_s25, 128, %s462_s18, [#allocation3]  }
  0x4c   : > { %p2659_p10 = pnand %p2658_p11, %p2652_p4 }
  0x4e   : > { %2662 = shalt.err (!%p2659_p10)
}
  0x4f   : > { %s3412_s30 = smov 4   ;;  %s3413_s19 = smov 64  }
  0x50   : > { %2419 = dma.hbm_to_vmem [thread:$0]  (!%p2983_p13), %s3367_s8, 256, %s488_s28, [#allocation6], %s3413_s19, %s3413_s19, %s3412_s30  }
  0x51   : > { %s2815_s18 = smov [#allocation10]   ;;  %s2816_s16 = smov [#allocation11]  }
  0x52   : > { %s511_s15 = sshll.u32 %s2815_s18, 4  ;;  %s525_s25 = sshll.u32 %s2816_s16, 4  ;;  %s512_s15 = int_to_ptr.vmem [resolvable:$true] %s511_s15  ;;  %s526_s25 = int_to_ptr.vmem [resolvable:$true] %s525_s25 }
  0x53   : > { %s2674_s6 = scalar_lea.vmem %s512_s15, 256  ;;  %p2682_p11 = scmp.lt.s32.totalorder %s512_s15, %s512_s15 }
  0x54   : > { %p2675_p8 = scmp.ne.s32.totalorder %s512_s15, %s2674_s6  ;;  %p2683_p1 = scmp.lt.s32.totalorder %s2674_s6, %s2674_s6 }
  0x56   : > { %p2677_p4 = pnand %p2675_p8, %p2989_p0  ;;  %p2684_p3 = por %p2683_p1, %p2682_p11 }
  0x58   : > { %p2678_p10 = pneg %p2677_p4 }
  0x5a   : > { %p2685_p2 = pnand %p2684_p3, %p2678_p10 }
  0x5c   : > { %2688 = shalt.err (!%p2685_p2)
}
  0x5d   : > { %2425 = dma.hbm_to_vmem [thread:$0]  (!%p2983_p13), %s3369_s10, 256, %s512_s15, [#allocation9], %s3413_s19, %s3413_s19, %s3412_s30  }
  0x5e   : > { %s2700_s23 = scalar_lea.vmem %s526_s25, 16  ;;  %s2707_s6 = scalar_lea.vmem %s526_s25, 32 }
  0x5f   : > { %p2701_p5 = scmp.ne.s32.totalorder %s526_s25, %s2700_s23  ;;  %p2708_p9 = scmp.lt.s32.totalorder %s526_s25, %s526_s25 }
  0x60   : > { %p2709_p12 = scmp.lt.s32.totalorder %s2707_s6, %s2700_s23 }
  0x61   : > { %p2703_p6 = pnand %p2701_p5, %p2989_p0 }
  0x62   : > { %p2710_p8 = por %p2709_p12, %p2708_p9 }
  0x63   : > { %p2704_p7 = pneg %p2703_p6 }
  0x65   : > { %p2711_p4 = pnand %p2710_p8, %p2704_p7 }
  0x67   : > { %2714 = shalt.err (!%p2711_p4)
}
  0x68   : > { %2428 = dma.hbm_to_vmem [thread:$0]  (!%p2983_p13), %s3370_s11, 16, %s526_s25, [#allocation12]  }
  0x69   : > { %p3414_p10 = scmp.ne.s32.totalorder %s3406_s20, 0 }
  0x6a   : > { %p3415_p11 = scmp.ne.s32.totalorder (!%p3414_p10), %s3407_s21, 0 }
  0x6b   : > { %586 = sbr.rel (%p3414_p10) target bundleno = 2365 (0x93d), region = 84 }
  0x70   : > { %2766 = dma.done.wait (%p3415_p11), [#allocation3], 128  }
  0x71   : > { %2768 = vsyncadd (%p3415_p11), [#allocation3], 4294967168 }
  0x72   : > { %2770 = dma.done.wait (%p3415_p11), [#allocation6], 512  }
  0x73   : > { %2772 = vsyncadd (%p3415_p11), [#allocation6], 4294966784 }
  0x74   : > { %2774 = dma.done.wait (%p3415_p11), [#allocation9], 272  }
  0x75   : > { %2776 = vsyncadd (%p3415_p11), [#allocation9], 4294967024 }
  0x76   : > { %2778 = dma.done.wait (%p3415_p11), [#allocation12], 16  }
  0x77   : > { %2780 = vsyncadd (%p3415_p11), [#allocation12], 4294967280  ;;  %p672_p13 = scmp.lt.s32.totalorder %s2799_s24, 1  ;;  %v2817_v0 = vmov 0.0   ;;  %vm2818_vm0 = vmmov 0   ;;  %v2515_v1 = vld [vmem:[#allocation5 + $0x8] sm:$0xff]  }
  0x78   : > { %2252 = vmatprep.subr.bf16.mxu0 %v2817_v0  ;;  %2260 = vmatprep.subr.bf16.mxu1 %v2817_v0  ;;  %v2516_v2 = vld [vmem:[#allocation7 + $0x8] sm:$0xff]   ;;  %s3416_s1 = sld [smem:[#allocation27_spill]]  ;;  %v2517_v3 = vld [vmem:[#allocation5] sm:$0xff]   ;;  %v2518_v4 = vld [vmem:[#allocation7] sm:$0xff]   ;;  %vm721_vm1 = vcmask 261120   ;;  %vm933_vm2 = vcmask 64512  }
  0x79   : > { %2256 = vmatprep.mubr.msk.bf16.mxu0 %vm2818_vm0, %v2817_v0  ;;  %2264 = vmatprep.mubr.msk.bf16.mxu1 %vm2818_vm0, %v2817_v0  ;;  %s3070_s29 = scalar_select %p672_p13, %s2799_s24, 1  ;;  %v2519_v9 = vld [vmem:[#allocation10 + $0x8] sm:$0xff]   ;;  %v2520_v10 = vld [vmem:[#allocation10] sm:$0xff]   ;;  %v2164_v13 = vld [vmem:[%s3366_s7] ss:$0 sm:$0xff]  ;;  %vm1171_vm3 = vcmask 1043456  }
  0x7a   : > { %2253 = vmatpush3.bf16.msra.mxu0 %v2515_v1  ;;  %2261 = vmatpush3.bf16.msra.mxu1 %v2516_v2  ;;  %v2168_v14 = vld [vmem:[#allocation8] ss:$0 sm:$0xff]  ;;  %s2819_s17 = smov 120   ;;  %s2820_s18 = smov 104   ;;  %v923_v41 = vld [vmem:[#allocation2] sm:$0xff]  ;;  %vm1826_vm4 = vcmask 130048  }
  0x7b   : > { %s2161_s21 = sshll.u32 %s3070_s29, 3  ;;  %2254 = vmatprep.subr.bf16.mxu0 %v2817_v0  ;;  %2262 = vmatprep.subr.bf16.mxu1 %v2817_v0  ;;  %s2822_s19 = smov 96   ;;  %vm1828_vm5 = vcmask 195584   ;;  %vm1831_vm6 = vcmask 326656   ;;  %vm1833_vm7 = vcmask 392192   ;;  %vm1835_vm8 = vcmask 457728  }
  0x7c   : > { %s682_s16 = scalar_lea.vmem %s3361_s2, %s2161_s21  ;;  %s686_s26 = scalar_lea.vmem %s3362_s3, %s2161_s21  ;;  %vm1877_vm9 = vcmask 523264  }
  0x7d   : > { %v695_v6 = vld [vmem:[%s682_s16] sm:$0xff]  ;;  %s692_s25 = scalar_lea.vmem %s3364_s5, %s3070_s29  ;;  %s2824_s28 = smov 16  }
  0x7e   : > { %s678_s30 = scalar_lea.vmem %s3416_s1, %s2161_s21  ;;  %2255 = vmatpush3.bf16.msra.mxu0 %v2517_v3  ;;  %v765_v8 = vpack.c.bf16 %v695_v6, %v695_v6  ;;  %2263 = vmatpush3.bf16.msra.mxu1 %v2518_v4  ;;  %v696_v11 = vld [vmem:[%s686_s26] sm:$0xff]  ;;  %s2821_s21 = smov 112  }
  0x7f   : > { %v3081_v5 = vld [vmem:[%s678_s30] sm:$0xff]  ;;  %2268 = vmatprep.subr.bf16.mxu0 %v2817_v0  ;;  %2276 = vmatprep.subr.bf16.mxu1 %v2817_v0  ;;  %v832_v12 = vpack.c.bf16 %v696_v11, %v696_v11  ;;  %s689_s30 = scalar_lea.vmem %s3363_s4, %s3070_s29  ;;  %s2823_s29 = smov 8  }
  0x80   : > { %v697_v7 = vpack.c.bf16 %v3081_v5, %v3081_v5  ;;  %v2176_v42 = vld [vmem:[%s689_s30] ss:$0 sm:$0xff]  ;;  %s2825_s26 = smov 24   ;;  %s2827_s15 = smov 40  }
  0x81   : > { %2265 = vmatmul.mubr.msk.bf16.vlgmr.msra.gmra.mxu1 %vm721_vm1, %v765_v8  ;;  %v931_v43 = vadd.f32 %v2176_v42, %v923_v41  ;;  %s2828_s16 = smov 48   ;;  %s3417_s20 = sld [smem:[#allocation29_spill]] }
  0x82   : > { %2257 = vmatmul.mubr.msk.bf16.vlgmr.msra.gmra.mxu0 %vm721_vm1, %v697_v7  ;;  %2278 = vmatprep.mubr.msk.bf16.mxu1 %vm2818_vm0, %v2817_v0  ;;  %s2203_s27 = sshll.u32 %s2799_s24, 7  ;;  %p3420_p1 = scmp.ne.s32.totalorder %s3402_s0, 0 }
  0x83   : > { %2272 = vmatprep.mubr.msk.bf16.mxu0 %vm2818_vm0, %v2817_v0  ;;  %2269 = vmatpush3.bf16.msra.mxu0 %v2519_v9 }
  0x84   : > { %2270 = vmatprep.subr.bf16.mxu0 %v2817_v0 }
  0x87   : > { %2271 = vmatpush3.bf16.msra.mxu0 %v2520_v10 }
  0x88   : > { %2282 = vmatprep.subr.bf16.mxu0 %v2817_v0 }
  0x8a   : > { %2273 = vmatmul.mubr.msk.bf16.vlgmr.msra.gmra.mxu0 %vm721_vm1, %v832_v12 }
  0x8b   : > { %2284 = vmatprep.mubr.msk.bf16.mxu0 %vm2818_vm0, %v2817_v0 }
 0x141   : > { %v826_v17 = vpop.f32.mrf.mxu1 }
 0x142   : > { %v759_v15 = vpop.f32.mrf.mxu0  ;;  %v827_v18 = vadd.f32 %v2168_v14, %v826_v17 }
 0x143   : > { %v760_v16 = vadd.f32 %v2164_v13, %v759_v15  ;;  %v2266_v21 = vpop.f32.mrf.mxu1 }
 0x144   : > { %v2258_v19 = vpop.f32.mrf.mxu0  ;;  %v3106_v22 = vpack.c.bf16 %v827_v18, %v827_v18 }
 0x145   : > { %v3104_v20 = vpack.c.bf16 %v760_v16, %v760_v16  ;;  %v829_v24 = vpop.f32.mrf.mxu1 }
 0x146   : > { %v762_v23 = vpop.f32.mrf.mxu0  ;;  %910 = vrot.lane.b32.xlu0 %v3106_v22, %s2819_s17  ;;  %v938_v25 = vsel %vm933_vm2, %v3106_v22, 0  ;;  %v2172_v24 = vld [vmem:[#allocation11] ss:$0 sm:$0xff] }
 0x147   : > { %903 = vrot.lane.b32.xlu1 %v3104_v20, %s2819_s17  ;;  %v2267_v27 = vpop.f32.mrf.mxu1  ;;  %2277 = vmatpush3.bf16.xpose.msra.mxu1 %v938_v25 }
 0x148   : > { %v2259_v26 = vpop.f32.mrf.mxu0  ;;  %2288 = vmatprep.subr.bf16.mxu1 %v2817_v0 }
 0x14a   : > { %912 = vrot.lane.b32.xlu0 %v3106_v22, %s2821_s21  ;;  %v3127_v28 = vpop.f32.mrf.mxu0 }
 0x14b   : > { %914 = vrot.lane.b32.xlu1 %v3106_v22, %s2820_s18  ;;  %v894_v25 = vadd.f32 %v2172_v24, %v3127_v28 }
 0x14c   : > { %v2274_v29 = vpop.f32.mrf.mxu0 }
 0x14d   : > { %v3174_v26 = vpack.c.bf16 %v894_v25, %v894_v25 }
 0x14e   : > { %2279 = vmatmul.mubr.msk.bf16.vlgmr.msra.gmra.mxu1 %vm933_vm2, %v3104_v20  ;;  %905 = vrot.lane.b32.xlu0 %v3104_v20, %s2821_s21  ;;  %v896_v30 = vpop.f32.mrf.mxu0 }
 0x14f   : > { %907 = vrot.lane.b32.xlu1 %v3104_v20, %s2820_s18  ;;  %2290 = vmatprep.mubr.msk.bf16.mxu1 %vm2818_vm0, %v2817_v0 }
 0x150   : > { %v2275_v31 = vpop.f32.mrf.mxu0 }
 0x1b8   : > { %v3129_v32 = vpop.permute.xlu0 %910 }
 0x1b9   : > { %v3131_v33 = vpop.permute.xlu1 %903  ;;  %v984_v34 = vsel %vm933_vm2, %v3129_v32, 0 }
 0x1ba   : > { %2283 = vmatpush3.bf16.xpose.msra.mxu0 %v984_v34 }
 0x1bb   : > { %2294 = vmatprep.subr.bf16.mxu0 %v2817_v0 }
 0x1bc   : > { %v913_v35 = vpop.permute.xlu0 %912 }
 0x1bd   : > { %v1030_v36 = vsel %vm933_vm2, %v913_v35, 0  ;;  %v915_v37 = vpop.permute.xlu1 %914 }
 0x1be   : > { %2289 = vmatpush3.bf16.xpose.msra.mxu1 %v1030_v36  ;;  %v1076_v38 = vsel %vm933_vm2, %v915_v37, 0 }
 0x1bf   : > { %2300 = vmatprep.subr.bf16.mxu1 %v2817_v0 }
 0x1c0   : > { %v3144_v39 = vpop.permute.xlu0 %905 }
 0x1c1   : > { %2285 = vmatmul.mubr.msk.bf16.vlgmr.msra.gmra.mxu0 %vm933_vm2, %v3131_v33  ;;  %v3150_v40 = vpop.permute.xlu1 %907 }
 0x1c2   : > { %2295 = vmatpush3.bf16.xpose.msra.mxu0 %v1076_v38  ;;  %2296 = vmatprep.mubr.msk.bf16.mxu0 %vm2818_vm0, %v2817_v0 }
 0x1c3   : > { %2306 = vmatprep.subr.bf16.mxu0 %v2817_v0 }
 0x1c5   : > { %2291 = vmatmul.mubr.msk.bf16.vlgmr.msra.gmra.mxu1 %vm933_vm2, %v3144_v39 }
 0x1c6   : > { %2302 = vmatprep.mubr.msk.bf16.mxu1 %vm2818_vm0, %v2817_v0 }
 0x1c9   : > { %2297 = vmatmul.mubr.msk.bf16.vlgmr.msra.gmra.mxu0 %vm933_vm2, %v3150_v40 }
 0x1ca   : > { %2308 = vmatprep.mubr.msk.bf16.mxu0 %vm2818_vm0, %v2817_v0 }
 0x20e   : > { %v974_v44 = vpop.f32.mrf.mxu1 }
 0x20f   : > { %v975_v45 = vadd.f32 %v974_v44, %v931_v43 }
 0x210   : > { %v2280_v46 = vpop.f32.mrf.mxu1 }
 0x211   : > { %v1118_v47 = vsel %vm933_vm2, %v975_v45, -inf }
 0x212   : > { %1119 = vmax.xlane.f32.xlu0 %v1118_v47  ;;  %v977_v48 = vpop.f32.mrf.mxu1 }
 0x214   : > { %v2281_v49 = vpop.f32.mrf.mxu1 }
 0x215   : > { %v1371_v49 = vsel %vm933_vm2, %v3174_v26, 0 }
 0x281   : > { %v1020_v50 = vpop.f32.mrf.mxu0 }
 0x282   : > { %v1021_v51 = vadd.f32 %v1020_v50, %v931_v43 }
 0x283   : > { %v2286_v52 = vpop.f32.mrf.mxu0 }
 0x284   : > { %v1121_v53 = vsel %vm933_vm2, %v1021_v51, -inf }
 0x285   : > { %v1066_v54 = vpop.f32.mrf.mxu1  ;;  %1122 = vmax.xlane.f32.xlu1 %v1121_v53  ;;  %v1023_v55 = vpop.f32.mrf.mxu0 }
 0x286   : > { %v1067_v56 = vadd.f32 %v1066_v54, %v931_v43 }
 0x287   : > { %v2287_v57 = vpop.f32.mrf.mxu0  ;;  %v2292_v58 = vpop.f32.mrf.mxu1 }
 0x288   : > { %v1124_v59 = vsel %vm933_vm2, %v1067_v56, -inf }
 0x289   : > { %1125 = vmax.xlane.f32.xlu0 %v1124_v59  ;;  %v1069_v60 = vpop.f32.mrf.mxu1  ;;  %v1112_v61 = vpop.f32.mrf.mxu0 }
 0x28a   : > { %v1113_v62 = vadd.f32 %v1112_v61, %v931_v43 }
 0x28b   : > { %v2293_v63 = vpop.f32.mrf.mxu1  ;;  %v2298_v1 = vpop.f32.mrf.mxu0 }
 0x28c   : > { %v1127_v2 = vsel %vm933_vm2, %v1113_v62, -inf }
 0x28d   : > { %1128 = vmax.xlane.f32.xlu0 %v1127_v2  ;;  %v1115_v3 = vpop.f32.mrf.mxu0 }
 0x28f   : > { %v2299_v4 = vpop.f32.mrf.mxu0 }
 0x296   : > { %1166 = vrot.lane.b32.xlu1 %v3106_v22, %s2822_s19 }
 0x29b   : > { %v1120_v6 = vpop.xlane.xlu0 %1119 }
 0x29c   : > { %v1130_v7 = vsub.f32 %v975_v45, %v1120_v6 }
 0x29e   : > { %v1134_v8 = vmul.f32 1.442695, %v1130_v7 }
 0x2a0   : > { %2525 = vpow2.f32 %v1134_v8 }
 0x2ad   : > { %v2526_v9 = vpop.eup %2525 }
 0x2ae   : > { %v1142_v10 = vsel %vm933_vm2, %v2526_v9, 0.0 }
 0x2ba   : > { %1143 = vadd.xlane.f32.xlu1 %v1142_v10 }
 0x2cb   : > { %1263 = vrot.lane.b32.xlu1 %v913_v35, %s2822_s19 }
 0x2cf   : > { %1311 = vrot.lane.b32.xlu1 %v915_v37, %s2822_s19 }
 0x30e   : > { %v1123_v11 = vpop.xlane.xlu1 %1122 }
 0x30f   : > { %v1131_v12 = vsub.f32 %v1021_v51, %v1123_v11 }
 0x311   : > { %v1136_v13 = vmul.f32 1.442695, %v1131_v12 }
 0x312   : > { %v1126_v14 = vpop.xlane.xlu0 %1125  ;;  %v1167_v15 = vpop.permute.xlu1 %1166 }
 0x313   : > { %2527 = vpow2.f32 %v1136_v13  ;;  %v1132_v16 = vsub.f32 %v1067_v56, %v1126_v14  ;;  %v1173_v17 = vsel %vm1171_vm3, %v1167_v15, 0  ;;  %v2185_v14 = vld [vmem:[%s692_s25] ss:$0 sm:$0xff]  ;;  %s2829_s25 = smov 56  }
 0x314   : > { %2301 = vmatpush3.bf16.msra.mxu1 %v1173_v17 }
 0x315   : > { %v1138_v18 = vmul.f32 1.442695, %v1132_v16  ;;  %2312 = vmatprep.subr.bf16.mxu1 %v2817_v0 }
 0x316   : > { %v1129_v27 = vpop.xlane.xlu0 %1128 }
 0x317   : > { %2529 = vpow2.f32 %v1138_v18  ;;  %v1133_v29 = vsub.f32 %v1113_v62, %v1129_v27 }
 0x319   : > { %v1140_v30 = vmul.f32 1.442695, %v1133_v29 }
 0x320   : > { %v2528_v19 = vpop.eup %2527 }
 0x321   : > { %v1145_v21 = vsel %vm933_vm2, %v2528_v19, 0.0 }
 0x322   : > { %1146 = vadd.xlane.f32.xlu0 %v1145_v21 }
 0x324   : > { %v2530_v22 = vpop.eup %2529 }
 0x325   : > { %v1148_v23 = vsel %vm933_vm2, %v2530_v22, 0.0 }
 0x326   : > { %1149 = vadd.xlane.f32.xlu1 %v1148_v23 }
 0x337   : > { %919 = vrot.lane.b32.xlu1 %v3174_v26, %s2821_s21 }
 0x338   : > { %1215 = vrot.lane.b32.xlu0 %v3129_v32, %s2822_s19 }
 0x33b   : > { %921 = vrot.lane.b32.xlu1 %v3174_v26, %s2820_s18 }
 0x33f   : > { %1461 = vrot.lane.b32.xlu1 %v3144_v39, %s2822_s19 }
 0x343   : > { %v1144_v31 = vpop.xlane.xlu1 %1143 }
 0x344   : > { %2531 = vrcp.f32 %v1144_v31 }
 0x345   : > { %2533 = vpow2.f32 %v1140_v30 }
 0x347   : > { %v1264_v36 = vpop.permute.xlu1 %1263 }
 0x348   : > { %v1269_v38 = vsel %vm1171_vm3, %v1264_v36, 0 }
 0x34b   : > { %v1312_v39 = vpop.permute.xlu1 %1311 }
 0x351   : > { %v2532_v28 = vpop.eup %2531 }
 0x352   : > { %v1158_v34 = vmul.f32 %v2532_v28, %v2526_v9  ;;  %v2534_v35 = vpop.eup %2533 }
 0x353   : > { %v1151_v32 = vsel %vm933_vm2, %v2534_v35, 0.0 }
 0x354   : > { %v1162_v37 = vpack.c.bf16 %v1158_v34, %v1158_v34 }
 0x356   : > { %2303 = vmatmul.mubr.msk.bf16.vlgmr.msra.gmra.mxu1 %vm933_vm2, %v1162_v37 }
 0x357   : > { %2313 = vmatpush3.bf16.msra.mxu1 %v1269_v38  ;;  %1152 = vadd.xlane.f32.xlu0 %v1151_v32 }
 0x358   : > { %2314 = vmatprep.mubr.msk.bf16.mxu1 %vm2818_vm0, %v2817_v0  ;;  %2324 = vmatprep.subr.bf16.mxu1 %v2817_v0 }
 0x36d   : > { %917 = vrot.lane.b32.xlu0 %v3174_v26, %s2819_s17  ;;  %s2826_s17 = smov 32  }
 0x371   : > { %1365 = vrot.lane.b32.xlu0 %v3104_v20, %s2822_s19 }
 0x375   : > { %1413 = vrot.lane.b32.xlu0 %v3131_v33, %s2822_s19  ;;  %v1317_v33 = vsel %vm1171_vm3, %v1312_v39, 0 }
 0x379   : > { %1509 = vrot.lane.b32.xlu0 %v3150_v40, %s2822_s19 }
 0x3ab   : > { %v1147_v41 = vpop.xlane.xlu0 %1146 }
 0x3ac   : > { %2535 = vrcp.f32 %v1147_v41 }
 0x3af   : > { %v1150_v42 = vpop.xlane.xlu1 %1149  ;;  %v1216_v43 = vpop.permute.xlu0 %1215 }
 0x3b0   : > { %2537 = vrcp.f32 %v1150_v42  ;;  %v1221_v44 = vsel %vm1171_vm3, %v1216_v43, 0 }
 0x3b1   : > { %2307 = vmatpush3.bf16.msra.mxu0 %v1221_v44 }
 0x3b2   : > { %2318 = vmatprep.subr.bf16.mxu0 %v2817_v0 }
 0x3b3   : > { %v3211_v51 = vpop.permute.xlu1 %919 }
 0x3b4   : > { %v1467_v54 = vsel %vm933_vm2, %v3211_v51, 0 }
 0x3b7   : > { %v3218_v55 = vpop.permute.xlu1 %921 }
 0x3b8   : > { %v1515_v62 = vsel %vm933_vm2, %v3218_v55, 0 }
 0x3b9   : > { %v2536_v45 = vpop.eup %2535 }
 0x3ba   : > { %v1159_v46 = vmul.f32 %v2536_v45, %v2528_v19 }
 0x3bb   : > { %v1462_v58 = vpop.permute.xlu1 %1461 }
 0x3bc   : > { %v1163_v20 = vpack.c.bf16 %v1159_v46, %v1159_v46 }
 0x3bd   : > { %v2538_v47 = vpop.eup %2537 }
 0x3be   : > { %2309 = vmatmul.mubr.msk.bf16.vlgmr.msra.gmra.mxu0 %vm933_vm2, %v1163_v20  ;;  %v1160_v40 = vmul.f32 %v2538_v47, %v2530_v22 }
 0x3bf   : > { %2319 = vmatpush3.bf16.msra.mxu0 %v1317_v33  ;;  %2320 = vmatprep.mubr.msk.bf16.mxu0 %vm2818_vm0, %v2817_v0 }
 0x3c0   : > { %v1164_v48 = vpack.c.bf16 %v1160_v40, %v1160_v40  ;;  %2330 = vmatprep.subr.bf16.mxu0 %v2817_v0 }
 0x3c2   : > { %2315 = vmatmul.mubr.msk.bf16.vlgmr.msra.gmra.mxu1 %vm933_vm2, %v1164_v48 }
 0x3c3   : > { %2325 = vmatpush3.bf16.xpose.msra.mxu1 %v1371_v49  ;;  %2326 = vmatprep.mubr.msk.bf16.mxu1 %vm2818_vm0, %v2817_v0 }
 0x3c4   : > { %2336 = vmatprep.subr.bf16.mxu1 %v2817_v0 }
 0x3e0   : > { %v1153_v50 = vpop.xlane.xlu0 %1152 }
 0x3e1   : > { %2539 = vrcp.f32 %v1153_v50 }
 0x3e4   : > { %v3213_v52 = vpop.permute.xlu0 %917 }
 0x3e5   : > { %v1419_v60 = vsel %vm933_vm2, %v3213_v52, 0 }
 0x3e8   : > { %v1366_v53 = vpop.permute.xlu0 %1365 }
 0x3e9   : > { %2327 = vmatmul.mubr.msk.bf16.vlgmr.msra.gmra.mxu1 %vm933_vm2, %v1366_v53 }
 0x3ea   : > { %2337 = vmatpush3.bf16.xpose.msra.mxu1 %v1467_v54  ;;  %2338 = vmatprep.mubr.msk.bf16.mxu1 %vm2818_vm0, %v2817_v0 }
 0x3eb   : > { %2348 = vmatprep.subr.bf16.mxu1 %v2817_v0 }
 0x3ec   : > { %v1414_v61 = vpop.permute.xlu0 %1413 }
 0x3ee   : > { %v2540_v56 = vpop.eup %2539 }
 0x3ef   : > { %v1161_v57 = vmul.f32 %v2540_v56, %v2534_v35 }
 0x3f0   : > { %v1510_v63 = vpop.permute.xlu0 %1509 }
 0x3f1   : > { %2339 = vmatmul.mubr.msk.bf16.vlgmr.msra.gmra.mxu1 %vm933_vm2, %v1462_v58  ;;  %v1165_v59 = vpack.c.bf16 %v1161_v57, %v1161_v57 }
 0x3f2   : > { %2350 = vmatprep.mubr.msk.bf16.mxu1 %vm2818_vm0, %v2817_v0 }
 0x3f3   : > { %2321 = vmatmul.mubr.msk.bf16.vlgmr.msra.gmra.mxu0 %vm933_vm2, %v1165_v59 }
 0x3f4   : > { %2331 = vmatpush3.bf16.xpose.msra.mxu0 %v1419_v60  ;;  %2332 = vmatprep.mubr.msk.bf16.mxu0 %vm2818_vm0, %v2817_v0 }
 0x3f5   : > { %2342 = vmatprep.subr.bf16.mxu0 %v2817_v0 }
 0x3fb   : > { %2333 = vmatmul.mubr.msk.bf16.vlgmr.msra.gmra.mxu0 %vm933_vm2, %v1414_v61 }
 0x3fc   : > { %2343 = vmatpush3.bf16.xpose.msra.mxu0 %v1515_v62  ;;  %2344 = vmatprep.mubr.msk.bf16.mxu0 %vm2818_vm0, %v2817_v0 }
 0x3fd   : > { %2354 = vmatprep.subr.bf16.mxu0 %v2817_v0 }
 0x403   : > { %2345 = vmatmul.mubr.msk.bf16.vlgmr.msra.gmra.mxu0 %vm933_vm2, %v1510_v63 }
 0x404   : > { %2356 = vmatprep.mubr.msk.bf16.mxu0 %vm2818_vm0, %v2817_v0 }
 0x416   : > { %v3241_v1 = vpop.f32.mrf.mxu1 }
 0x418   : > { %v2304_v2 = vpop.f32.mrf.mxu1 }
 0x41a   : > { %v1212_v3 = vpop.f32.mrf.mxu1 }
 0x41c   : > { %v2305_v4 = vpop.f32.mrf.mxu1 }
 0x47e   : > { %v3243_v6 = vpop.f32.mrf.mxu0 }
 0x480   : > { %v2310_v7 = vpop.f32.mrf.mxu0 }
 0x482   : > { %v1260_v8 = vpop.f32.mrf.mxu0  ;;  %v3245_v9 = vpop.f32.mrf.mxu1 }
 0x484   : > { %v2311_v10 = vpop.f32.mrf.mxu0  ;;  %v2316_v11 = vpop.f32.mrf.mxu1 }
 0x486   : > { %v1308_v12 = vpop.f32.mrf.mxu1 }
 0x488   : > { %v2317_v13 = vpop.f32.mrf.mxu1 }
 0x4a9   : > { %v1407_v15 = vpop.f32.mrf.mxu1 }
 0x4aa   : > { %v1408_v16 = vadd.f32 %v2185_v14, %v1407_v15 }
 0x4ab   : > { %v2328_v17 = vpop.f32.mrf.mxu1 }
 0x4ac   : > { %v1557_v18 = vsel %vm933_vm2, %v1408_v16, -inf }
 0x4ad   : > { %1558 = vmax.xlane.f32.xlu1 %v1557_v18  ;;  %v1410_v19 = vpop.f32.mrf.mxu1 }
 0x4af   : > { %v2329_v21 = vpop.f32.mrf.mxu1 }
 0x4b1   : > { %v1503_v22 = vpop.f32.mrf.mxu1 }
 0x4b2   : > { %v1504_v36 = vadd.f32 %v2185_v14, %v1503_v22 }
 0x4b3   : > { %v3252_v23 = vpop.f32.mrf.mxu0  ;;  %v2340_v24 = vpop.f32.mrf.mxu1 }
 0x4b4   : > { %v1563_v39 = vsel %vm933_vm2, %v1504_v36, -inf }
 0x4b5   : > { %v2322_v25 = vpop.f32.mrf.mxu0  ;;  %v1506_v27 = vpop.f32.mrf.mxu1 }
 0x4b7   : > { %v1356_v29 = vpop.f32.mrf.mxu0  ;;  %v2341_v30 = vpop.f32.mrf.mxu1 }
 0x4b8   : > { %v2521_v29 = vld [vmem:[%s3371_s12 + $0x18] sm:$0xff]  }
 0x4b9   : > { %v2323_v31 = vpop.f32.mrf.mxu0 }
 0x4bb   : > { %v1455_v28 = vpop.f32.mrf.mxu0 }
 0x4bc   : > { %v1456_v34 = vadd.f32 %v2185_v14, %v1455_v28 }
 0x4bd   : > { %v2334_v35 = vpop.f32.mrf.mxu0 }
 0x4be   : > { %v1560_v37 = vsel %vm933_vm2, %v1456_v34, -inf }
 0x4bf   : > { %1561 = vmax.xlane.f32.xlu0 %v1560_v37  ;;  %v1458_v38 = vpop.f32.mrf.mxu0  ;;  %v2524_v37 = vld [vmem:[%s3371_s12] sm:$0xff]  }
 0x4c1   : > { %v2335_v32 = vpop.f32.mrf.mxu0 }
 0x4c3   : > { %1564 = vmax.xlane.f32.xlu0 %v1563_v39  ;;  %v1551_v41 = vpop.f32.mrf.mxu0 }
 0x4c4   : > { %v1552_v42 = vadd.f32 %v2185_v14, %v1551_v41 }
 0x4c5   : > { %v2346_v43 = vpop.f32.mrf.mxu0 }
 0x4c6   : > { %v1566_v44 = vsel %vm933_vm2, %v1552_v42, -inf }
 0x4c7   : > { %1567 = vmax.xlane.f32.xlu1 %v1566_v44  ;;  %v1554_v45 = vpop.f32.mrf.mxu0 }
 0x4c9   : > { %v2347_v46 = vpop.f32.mrf.mxu0 }
 0x4d8   : > { %1653 = vrot.lane.b32.xlu1 %v3213_v52, %s2822_s19 }
 0x4d9   : > { %1605 = vrot.lane.b32.xlu0 %v3174_v26, %s2822_s19 }
 0x536   : > { %v1559_v20 = vpop.xlane.xlu1 %1558 }
 0x537   : > { %v1569_v47 = vsub.f32 %v1408_v16, %v1559_v20 }
 0x539   : > { %v1573_v33 = vmul.f32 1.442695, %v1569_v47 }
 0x53b   : > { %2541 = vpow2.f32 %v1573_v33 }
 0x548   : > { %v2542_v40 = vpop.eup %2541  ;;  %v1562_v48 = vpop.xlane.xlu0 %1561 }
 0x549   : > { %v1570_v49 = vsub.f32 %v1456_v34, %v1562_v48  ;;  %v1581_v50 = vsel %vm933_vm2, %v2542_v40, 0.0  ;;  %v2522_v34 = vld [vmem:[%s3371_s12 + $0x10] sm:$0xff]  }
 0x54a   : > { %1582 = vadd.xlane.f32.xlu0 %v1581_v50 }
 0x54b   : > { %v1575_v53 = vmul.f32 1.442695, %v1570_v49 }
 0x54c   : > { %v1565_v54 = vpop.xlane.xlu0 %1564 }
 0x54d   : > { %2543 = vpow2.f32 %v1575_v53  ;;  %v1571_v56 = vsub.f32 %v1504_v36, %v1565_v54  ;;  %v2523_v36 = vld [vmem:[%s3371_s12 + $0x8] sm:$0xff]  }
 0x54f   : > { %v1577_v57 = vmul.f32 1.442695, %v1571_v56 }
 0x550   : > { %v1606_v58 = vpop.permute.xlu0 %1605  ;;  %v1568_v52 = vpop.xlane.xlu1 %1567 }
 0x551   : > { %2545 = vpow2.f32 %v1577_v57  ;;  %v1611_v26 = vsel %vm1171_vm3, %v1606_v58, 0  ;;  %v1572_v59 = vsub.f32 %v1552_v42, %v1568_v52 }
 0x552   : > { %2349 = vmatpush3.bf16.msra.mxu1 %v1611_v26 }
 0x553   : > { %v1579_v60 = vmul.f32 1.442695, %v1572_v59  ;;  %2360 = vmatprep.subr.bf16.mxu1 %v2817_v0 }
 0x554   : > { %v1654_v61 = vpop.permute.xlu1 %1653 }
 0x555   : > { %2547 = vpow2.f32 %v1579_v60  ;;  %v1659_v62 = vsel %vm1171_vm3, %v1654_v61, 0 }
 0x556   : > { %2355 = vmatpush3.bf16.msra.mxu0 %v1659_v62 }
 0x557   : > { %2366 = vmatprep.subr.bf16.mxu0 %v2817_v0 }
 0x55a   : > { %v2544_v63 = vpop.eup %2543 }
 0x55b   : > { %v1584_v2 = vsel %vm933_vm2, %v2544_v63, 0.0 }
 0x55c   : > { %1585 = vadd.xlane.f32.xlu1 %v1584_v2 }
 0x55e   : > { %v2546_v3 = vpop.eup %2545 }
 0x55f   : > { %v1587_v4 = vsel %vm933_vm2, %v2546_v3, 0.0 }
 0x560   : > { %1588 = vadd.xlane.f32.xlu0 %v1587_v4 }
 0x562   : > { %v2548_v7 = vpop.eup %2547 }
 0x563   : > { %v1590_v8 = vsel %vm933_vm2, %v2548_v7, 0.0 }
 0x564   : > { %1591 = vadd.xlane.f32.xlu1 %v1590_v8 }
 0x575   : > { %1701 = vrot.lane.b32.xlu1 %v3211_v51, %s2822_s19 }
 0x576   : > { %1749 = vrot.lane.b32.xlu0 %v3218_v55, %s2822_s19 }
 0x579   : > { %1798 = vrot.lane.b32.xlu1 %v3243_v6, %s2823_s29 }
 0x57a   : > { %1802 = vrot.lane.b32.xlu0 %v3245_v9, %s2824_s28 }
 0x57d   : > { %1806 = vrot.lane.b32.xlu1 %v3252_v23, %s2825_s26  ;;  %s669_s26 = sand.u32 1, %s2791_s22  }
 0x57e   : > { %s2160_s23 = sshll.u32 %s669_s26, 3  ;;  %s1954_s1 = scalar_lea.sflag [#allocation4], %s669_s26 }
 0x57f   : > { %s671_s30 = scalar_lea.vmem [#allocation13], %s2160_s23 }
 0x580   : > { %s1968_s19 = sshll.u32 %s671_s30, 4  ;;  %s1969_s19 = int_to_ptr.vmem [resolvable:$true] %s1968_s19 }
 0x581   : > { %s2715_s6 = scalar_lea.vmem %s1969_s19, 128 }
 0x582   : > { %p2716_p0 = scmp.ne.s32.totalorder %s1969_s19, %s2715_s6 }
 0x584   : > { %p2717_p3 = pnand %p2716_p0, %p3420_p1 }
 0x586   : > { %p2718_p2 = pneg %p2717_p3 }
 0x5d3   : > { %v1583_v10 = vpop.xlane.xlu0 %1582 }
 0x5d4   : > { %2549 = vrcp.f32 %v1583_v10 }
 0x5e1   : > { %v2550_v11 = vpop.eup %2549 }
 0x5e2   : > { %v1597_v12 = vmul.f32 %v2550_v11, %v2542_v40 }
 0x5e4   : > { %v1601_v13 = vpack.c.bf16 %v1597_v12, %v1597_v12 }
 0x5e5   : > { %v1586_v14 = vpop.xlane.xlu1 %1585 }
 0x5e6   : > { %2551 = vrcp.f32 %v1586_v14  ;;  %2351 = vmatmul.mubr.msk.bf16.vlgmr.msra.gmra.mxu1 %vm933_vm2, %v1601_v13 }
 0x5e7   : > { %2362 = vmatprep.mubr.msk.bf16.mxu1 %vm2818_vm0, %v2817_v0 }
 0x5e9   : > { %v1589_v51 = vpop.xlane.xlu0 %1588 }
 0x5ea   : > { %2553 = vrcp.f32 %v1589_v51 }
 0x5ed   : > { %v1592_v55 = vpop.xlane.xlu1 %1591  ;;  %v1750_v17 = vpop.permute.xlu0 %1749 }
 0x5ee   : > { %2555 = vrcp.f32 %v1592_v55  ;;  %v1755_v21 = vsel %vm1171_vm3, %v1750_v17, 0 }
 0x5f1   : > { %v1702_v6 = vpop.permute.xlu1 %1701  ;;  %v1803_v40 = vpop.permute.xlu0 %1802 }
 0x5f2   : > { %v1707_v9 = vsel %vm1171_vm3, %v1702_v6, 0 }
 0x5f3   : > { %v2552_v15 = vpop.eup %2551  ;;  %2361 = vmatpush3.bf16.msra.mxu1 %v1707_v9  ;;  %v2200_v9 = vld [vmem:[%s3373_s14] ss:$0 sm:$0xff] }
 0x5f4   : > { %v1598_v16 = vmul.f32 %v2552_v15, %v2544_v63  ;;  %2372 = vmatprep.subr.bf16.mxu1 %v2817_v0 }
 0x5f5   : > { %v1799_v33 = vpop.permute.xlu1 %1798 }
 0x5f6   : > { %v1602_v18 = vpack.c.bf16 %v1598_v16, %v1598_v16  ;;  %v1825_v49 = vsel %vm933_vm2, %v3241_v1, %v1799_v33  ;;  %v2194_v1 = vld [vmem:[%s3372_s13] ss:$0 sm:$0xff] }
 0x5f7   : > { %v2554_v19 = vpop.eup %2553  ;;  %v1827_v53 = vsel %vm1826_vm4, %v1825_v49, %v1803_v40  ;;  %v2201_v16 = vld [vmem:[%s3417_s20] ss:$0 sm:$0xff] }
 0x5f8   : > { %2357 = vmatmul.mubr.msk.bf16.vlgmr.msra.gmra.mxu0 %vm933_vm2, %v1602_v18  ;;  %v1599_v22 = vmul.f32 %v2554_v19, %v2546_v3 }
 0x5f9   : > { %2367 = vmatpush3.bf16.msra.mxu0 %v1755_v21  ;;  %2368 = vmatprep.mubr.msk.bf16.mxu0 %vm2818_vm0, %v2817_v0  ;;  %v1807_v48 = vpop.permute.xlu1 %1806 }
 0x5fa   : > { %v1603_v23 = vpack.c.bf16 %v1599_v22, %v1599_v22  ;;  %v1829_v56 = vsel %vm1828_vm5, %v1827_v53, %v1807_v48 }
 0x5fb   : > { %v2556_v24 = vpop.eup %2555 }
 0x5fc   : > { %2363 = vmatmul.mubr.msk.bf16.vlgmr.msra.gmra.mxu1 %vm933_vm2, %v1603_v23  ;;  %v1600_v25 = vmul.f32 %v2556_v24, %v2548_v7 }
 0x5fd   : > { %2380 = vmatprep.mubr.msk.bf16.mxu1 %vm2818_vm0, %v2817_v0  ;;  %2373 = vmatpush3.bf16.msra.mxu1 %v2521_v29 }
 0x5fe   : > { %v1604_v27 = vpack.c.bf16 %v1600_v25, %v1600_v25  ;;  %2374 = vmatprep.subr.bf16.mxu1 %v2817_v0 }
 0x600   : > { %2369 = vmatmul.mubr.msk.bf16.vlgmr.msra.gmra.mxu0 %vm933_vm2, %v1604_v27 }
 0x601   : > { %2375 = vmatpush3.bf16.msra.mxu1 %v2522_v34 }
 0x602   : > { %2376 = vmatprep.subr.bf16.mxu1 %v2817_v0 }
 0x605   : > { %2377 = vmatpush3.bf16.msra.mxu1 %v2523_v36 }
 0x606   : > { %2378 = vmatprep.subr.bf16.mxu1 %v2817_v0 }
 0x609   : > { %2379 = vmatpush3.bf16.msra.mxu1 %v2524_v37 }
 0x6a6   : > { %v1647_v30 = vpop.f32.mrf.mxu1 }
 0x6a7   : > { %1810 = vrot.lane.b32.xlu0 %v1647_v30, %s2826_s17  ;;  %s2830_s17 = smov [#allocation13]  }
 0x6a8   : > { %v2352_v31 = vpop.f32.mrf.mxu1  ;;  %s2719_s18 = sshll.u32 %s2830_s17, 4  ;;  %s2720_s18 = int_to_ptr.vmem [resolvable:$false] %s2719_s18 }
 0x6a9   : > { %s2721_s24 = scalar_lea.vmem %s2720_s18, 256  ;;  %p2722_p5 = scmp.lt.s32.totalorder %s1969_s19, %s2720_s18 }
 0x6aa   : > { %v1650_v28 = vpop.f32.mrf.mxu1  ;;  %p2723_p6 = scmp.lt.s32.totalorder %s2721_s24, %s2715_s6 }
 0x6ac   : > { %v2353_v35 = vpop.f32.mrf.mxu1  ;;  %p2724_p7 = por %p2723_p6, %p2722_p5 }
 0x6ae   : > { %p2725_p9 = pnand %p2724_p7, %p2718_p2 }
 0x6b8   : > { %v1695_v38 = vpop.f32.mrf.mxu0 }
 0x6b9   : > { %1814 = vrot.lane.b32.xlu1 %v1695_v38, %s2827_s15 }
 0x6ba   : > { %v2358_v32 = vpop.f32.mrf.mxu0 }
 0x6bc   : > { %v1698_v39 = vpop.f32.mrf.mxu0  ;;  %v1743_v41 = vpop.f32.mrf.mxu1 }
 0x6bd   : > { %1818 = vrot.lane.b32.xlu0 %v1743_v41, %s2828_s16 }
 0x6be   : > { %v2359_v42 = vpop.f32.mrf.mxu0  ;;  %v2364_v43 = vpop.f32.mrf.mxu1 }
 0x6c0   : > { %v1746_v44 = vpop.f32.mrf.mxu1  ;;  %v1791_v45 = vpop.f32.mrf.mxu0 }
 0x6c1   : > { %1822 = vrot.lane.b32.xlu1 %v1791_v45, %s2829_s25  ;;  %s3418_s25 = sld [smem:[#allocation30_spill]] }
 0x6c2   : > { %v2365_v0 = vpop.f32.mrf.mxu1  ;;  %v2370_v46 = vpop.f32.mrf.mxu0 }
 0x6c4   : > { %v1794_v20 = vpop.f32.mrf.mxu0 }
 0x6c6   : > { %v2371_v47 = vpop.f32.mrf.mxu0 }
 0x6c7   : > { %s3419_s29 = smov %s3418_s25  ;;  %s1966_s28 = scalar_lea.hbm %s3418_s25, %s2203_s27 }
 0x719   : > { %v1811_v50 = vpop.permute.xlu0 %1810 }
 0x71a   : > { %v1830_v58 = vsel %vm721_vm1, %v1829_v56, %v1811_v50 }
 0x72b   : > { %v1815_v54 = vpop.permute.xlu1 %1814 }
 0x72c   : > { %v1832_v52 = vsel %vm1831_vm6, %v1830_v58, %v1815_v54 }
 0x72f   : > { %v1819_v57 = vpop.permute.xlu0 %1818 }
 0x730   : > { %v1834_v26 = vsel %vm1833_vm7, %v1832_v52, %v1819_v57 }
 0x733   : > { %v1823_v59 = vpop.permute.xlu1 %1822 }
 0x734   : > { %v1836_v60 = vsel %vm1835_vm8, %v1834_v26, %v1823_v59 }
 0x735   : > { %v1837_v61 = vpack.c.bf16 %v1836_v60, %v1836_v60 }
 0x737   : > { %2381 = vmatmul.mubr.msk.bf16.vlgmr.msra.gmra.mxu1 %vm1877_vm9, %v1837_v61 }
 0x7f7   : > { %v1915_v62 = vpop.f32.mrf.mxu1 }
 0x7f8   : > { %v1916_v63 = vadd.f32 %v2194_v1, %v1915_v62 }
 0x7f9   : > { %v2382_v2 = vpop.f32.mrf.mxu1 }
 0x7fa   : > { %v1921_v3 = vadd.f32 %v1916_v63, %v3081_v5 }
 0x7fb   : > { %v1918_v4 = vpop.f32.mrf.mxu1 }
 0x7fc   : > { %v1922_v7 = vsel %vm721_vm1, %v1921_v3, 0.0 }
 0x7fd   : > { %1923 = vadd.xlane.f32.xlu0 %v1922_v7  ;;  %v2383_v8 = vpop.f32.mrf.mxu1 }
 0x886   : > { %v1924_v10 = vpop.xlane.xlu0 %1923 }
 0x887   : > { %v1926_v11 = vmul.f32 0.03125, %v1924_v10 }
 0x889   : > { %v1927_v12 = vsub.f32 %v1921_v3, %v1926_v11 }
 0x88b   : > { %v1928_v13 = vmul.f32 %v1927_v12, %v1927_v12 }
 0x88d   : > { %v1929_v14 = vsel %vm721_vm1, %v1928_v13, 0.0 }
 0x88e   : > { %1930 = vadd.xlane.f32.xlu1 %v1929_v14 }
 0x917   : > { %v1931_v51 = vpop.xlane.xlu1 %1930 }
 0x918   : > { %v1932_v55 = vmul.f32 0.03125, %v1931_v51 }
 0x91a   : > { %v1933_v6 = vadd.f32 1e-05, %v1932_v55 }
 0x91c   : > { %2557 = vrsqrt.f32 %v1933_v6 }
 0x929   : > { %v2558_v5 = vpop.eup %2557 }
 0x92a   : > { %v1935_v15 = vmul.f32 %v2558_v5, %v1927_v12 }
 0x92c   : > { %v1943_v17 = vmul.f32 %v2200_v9, %v1935_v15 }
 0x92e   : > { %v1951_v18 = vadd.f32 %v2201_v16, %v1943_v17 }
 0x930   : > { %1952 = vst.msk [vmem:[%s671_s30] sm:$0xff] %vm721_vm1, %v1951_v18 }
 0x931   : > { %2728 = shalt.err (!%p2725_p9)
}
 0x932   : > { %s2729_s23 = scalar_lea.hbm %s1966_s28, 128  ;;  %s2733_s20 = scalar_lea.hbm %s3419_s29, 256 }
 0x933   : > { %p2730_p12 = scmp.ne.s32.totalorder %s1966_s28, %s2729_s23  ;;  %p2734_p10 = scmp.lt.s32.totalorder %s1966_s28, %s3419_s29 }
 0x934   : > { %p2735_p11 = scmp.lt.s32.totalorder %s2733_s20, %s2729_s23 }
 0x935   : > { %p2731_p8 = pnand %p2730_p12, %p3420_p1 }
 0x936   : > { %p2736_p13 = por %p2735_p11, %p2734_p10 }
 0x937   : > { %p2732_p4 = pneg %p2731_p8 }
 0x939   : > { %p2737_p0 = pnand %p2736_p13, %p2732_p4 }
 0x93b   : > { %2740 = shalt.err (!%p2737_p0)
}
 0x93c   : > { %2408 = dma.vmem_to_hbm [thread:$0]  (%p3420_p1), %s1969_s19, 128, %s1966_s28, %s1954_s1  }
 0x93d PF: > { %s3421_s15 = sld [smem:[#allocation22_spill]] }
 0x93e   : > { %s3422_s16 = sld [smem:[#allocation19_spill]] }
 0x93f   : > { %s3423_s25 = sld [smem:[#allocation24_spill]] }
 0x943   : > { %p2445_p3 = scmp.ge.s32.totalorder %s3421_s15, 2 }
 0x944   : > { %s1980_s6 = sand.u32 1, %s3422_s16  }
 0x945   : > { %p3424_p2 = scmp.ne.s32.totalorder %s3423_s25, 0  ;;  %s1981_s17 = scalar_lea.sflag [#allocation4], %s1980_s6 }
 0x947   : > { %p2430_p5 = pnand %p2445_p3, %p3424_p2 }
 0x949   : > { %p2431_p6 = pneg %p2430_p5 }
 0x94b   : > { %2782 = dma.done.wait (%p2431_p6), %s1981_s17, 128  }
 0x94c   : > { %2784 = vsyncadd (%p2431_p6), %s1981_s17, 4294967168  ;;  %s33_s26 = sadd.s32 1, %s3421_s15   ;;  %s3425_s18 = sld [smem:[#allocation20_spill]] }
 0x94d   : > { %p30_p7 = scmp.ge.s32.totalorder %s33_s26, 4   ;;  %s3426_s23 = sld [smem:[#allocation25_spill]] }
 0x94e   : > { %s3427_s24 = sld [smem:[#allocation21_spill]]  ;;  %s3429_s21 = smov %s2791_s22 }
 0x94f   : > { %s3428_s25 = sld [smem:[#allocation23_spill]]  ;;  %32 = sbr.rel (!%p30_p7) target bundleno = 14 (0xe), region = 157 }
 0x952   : > { %s3430_s22 = smov %s3425_s18 }
 0x954   :  { %1986 = vsyncpa [#allocation3], 1 }
 0x955   :  { %1988 = vsyncpa [#allocation3 + $0x1], 1 }
 0x956   :  { %1989 = vsyncpa [#allocation6], 1 }
 0x957   :  { %1990 = vsyncpa [#allocation9], 1 }
 0x958   :  { %1991 = vsyncpa [#allocation12], 1 }
 0x959   :  { %1992 = vsyncpa [#allocation4], 1 }
 0x95a   :  { %1994 = vsyncpa [#allocation4 + $0x1], 1 }

</bundles_post_ra>
